<compile_context>
chip_gen: v6e
topology: v6e:2x2x1
jax: 0.10.0
libtpu: 0.0.40
codegen_flags: <defaults>
</compile_context>

<pallas_src>
import math
import jax
import jax.numpy as jnp
from jax import lax
from jax.experimental import pallas as pl
from jax.experimental.pallas import tpu as pltpu

HIDDEN = 32          # hidden_size
NUM_STATES = 6       # ProPara-style state tag count (module references global NUM_STATES)
NP = 128             # lane-padded tag width for lane-dense output stores


def state_tracker_kernel(enc_ref, msk_ref,
                         wih_ref, whh_ref, b_ref,
                         wtag_ref, btag_ref,
                         out_ref,
                         xg_ref, hf_ref, hb_ref):
    H = HIDDEN
    S = hf_ref.shape[0]
    Bb = hf_ref.shape[1]
    np_ = wtag_ref.shape[1]

    x = enc_ref[...]                    # (Bb, T, 2H)
    m = msk_ref[...]                    # (Bb, 2S, T): rows [0:S]=entity, [S:2S]=verb

    # ---- masked mean (entity + verb in one batched matmul) ----
    msum = jnp.einsum('bmt,bth->bmh', m, x,
                      preferred_element_type=jnp.float32)        # (Bb, 2S, 2H)
    cnt = jnp.sum(m, axis=-1, keepdims=True)                     # (Bb, 2S, 1)
    mean = msum / jnp.where(cnt == 0.0, 1.0, cnt)                # safe 0/0 -> 0 (masks binary)
    ent_mean = mean[:, :S, :]
    vrb_mean = mean[:, S:, :]
    dec_in = jnp.concatenate([ent_mean, vrb_mean], axis=-1)      # (Bb, S, 4H)
    ent_cnt = cnt[:, :S, :]
    dec_in = jnp.where(ent_cnt == 0.0, 0.0, dec_in)              # all-zero-entity rows -> 0

    # ---- fused (fwd|bwd, interleaved-gate) input projection: one matmul ----
    xg = jnp.dot(dec_in.reshape(Bb * S, 4 * H), wih_ref[...],
                 preferred_element_type=jnp.float32) + b_ref[...]   # (Bb*S, 8H)
    xg = xg.reshape(Bb, S, 8 * H)
    for s in range(S):                                            # time-major scratch
        xg_ref[s] = xg[:, s, :]                                   # (Bb, 8H)

    # lane masks (hoisted out of the recurrence)
    lane = lax.broadcasted_iota(jnp.int32, (Bb, 8 * H), 1)
    is_fwd = (lane % (2 * H)) < H                 # fwd half of each interleaved gate block
    is_tanh = (lane >= 4 * H) & (lane < 6 * H)    # the "g" gate lanes

    whh = whh_ref[...]                            # (2H, 8H) block-diagonal fused recurrence
    h = jnp.zeros((Bb, 2 * H), jnp.float32)       # [h_fwd | h_bwd]
    c = jnp.zeros((Bb, 2 * H), jnp.float32)       # [c_fwd | c_bwd]

    # ---- fused fwd+bwd recurrence, fully unrolled (S is a small static constant) ----
    for k in range(S):
        t_f = k
        t_b = S - 1 - k
        x_in = jnp.where(is_fwd, xg_ref[t_f], xg_ref[t_b])        # (Bb, 8H)
        g = x_in + jnp.dot(h, whh, preferred_element_type=jnp.float32)
        act = jnp.where(is_tanh, jnp.tanh(g), jax.nn.sigmoid(g))  # full-width EUP passes
        i_g = act[:, 0:2 * H]
        f_g = act[:, 2 * H:4 * H]
        g_g = act[:, 4 * H:6 * H]
        o_g = act[:, 6 * H:8 * H]
        c = f_g * c + i_g * g_g
        h = o_g * jnp.tanh(c)
        hf_ref[t_f] = h[:, 0:H]                                   # forward hidden @ t_f
        hb_ref[t_b] = h[:, H:2 * H]                               # backward hidden @ t_b

    # ---- Dropout (eval: identity) + Hidden2Tag, lane-dense output ----
    dec_out = jnp.concatenate([hf_ref[...], hb_ref[...]], axis=-1)    # (S, Bb, 2H)
    logits = jnp.dot(dec_out.reshape(S * Bb, 2 * H), wtag_ref[...],
                     preferred_element_type=jnp.float32) + btag_ref[...]   # (S*Bb, NP)
    out_ref[...] = logits.reshape(S, Bb, np_)


def _fuse_params(params):
    """Build interleaved-gate fused weights:
       gate layout = [i_f|i_b | f_f|f_b | g_f|g_b | o_f|o_b], each block H lanes."""
    H = HIDDEN
    wih_f_t = params["w_ih_f"].T       # (4H, 4H), columns [i,f,g,o]
    wih_b_t = params["w_ih_b"].T
    whh_f_t = params["w_hh_f"].T       # (H, 4H)
    whh_b_t = params["w_hh_b"].T
    bf = params["b_ih_f"] + params["b_hh_f"]
    bb = params["b_ih_b"] + params["b_hh_b"]

    zH = jnp.zeros((H, H), jnp.float32)
    wih_cols, whh_cols, b_parts = [], [], []
    for g in range(4):
        sl = slice(g * H, (g + 1) * H)
        wih_cols.append(wih_f_t[:, sl])
        wih_cols.append(wih_b_t[:, sl])
        # block-diagonal recurrence: h_fwd rows feed fwd lanes, h_bwd rows feed bwd lanes
        whh_cols.append(jnp.concatenate([whh_f_t[:, sl], zH], axis=0))   # (2H, H)
        whh_cols.append(jnp.concatenate([zH, whh_b_t[:, sl]], axis=0))   # (2H, H)
        b_parts.append(bf[sl])
        b_parts.append(bb[sl])

    wih_fused = jnp.concatenate(wih_cols, axis=1)            # (4H, 8H)
    whh_fused = jnp.concatenate(whh_cols, axis=1)            # (2H, 8H)
    b_fused = jnp.concatenate(b_parts).reshape(1, 8 * H)     # (1, 8H)

    wtag_pad = jnp.zeros((2 * H, NP), jnp.float32).at[:, :NUM_STATES].set(params["w_tag"].T)
    btag_pad = jnp.zeros((1, NP), jnp.float32).at[0, :NUM_STATES].set(params["b_tag"])
    return wih_fused, whh_fused, b_fused, wtag_pad, btag_pad


def state_tracker_forward(encoder_out, entity_mask, verb_mask, params, block_b=8):
    B, T, twoH = encoder_out.shape
    S = entity_mask.shape[1]
    H = HIDDEN
    assert twoH == 2 * H

    Bb = block_b
    B_pad = ((B + Bb - 1) // Bb) * Bb
    pad = B_pad - B
    if pad:
        encoder_out = jnp.pad(encoder_out, ((0, pad), (0, 0), (0, 0)))
        entity_mask = jnp.pad(entity_mask, ((0, pad), (0, 0), (0, 0)))
        verb_mask = jnp.pad(verb_mask, ((0, pad), (0, 0), (0, 0)))

    # single mask input: one DMA + one batched matmul per grid step
    masks = jnp.concatenate([entity_mask, verb_mask], axis=1)        # (B_pad, 2S, T)

    wih_fused, whh_fused, b_fused, wtag_pad, btag_pad = _fuse_params(params)

    def const2d(shape):
        return pl.BlockSpec(shape, lambda i: (0, 0))

    grid_spec = pltpu.PrefetchScalarGridSpec(
        num_scalar_prefetch=0,
        grid=(B_pad // Bb,),
        in_specs=[
            pl.BlockSpec((Bb, T, twoH), lambda i: (i, 0, 0)),
            pl.BlockSpec((Bb, 2 * S, T), lambda i: (i, 0, 0)),
            const2d(wih_fused.shape), const2d(whh_fused.shape), const2d(b_fused.shape),
            const2d(wtag_pad.shape), const2d(btag_pad.shape),
        ],
        # lane-dense output block (S, Bb, 128); wrapper transposes/slices afterwards
        out_specs=pl.BlockSpec((S, Bb, NP), lambda i: (0, i, 0)),
        scratch_shapes=[
            pltpu.VMEM((S, Bb, 8 * H), jnp.float32),   # fused input-gate projections (time-major)
            pltpu.VMEM((S, Bb, H), jnp.float32),       # forward hidden states
            pltpu.VMEM((S, Bb, H), jnp.float32),       # backward hidden states
        ],
    )

    out = pl.pallas_call(
        state_tracker_kernel,
        out_shape=jax.ShapeDtypeStruct((S, B_pad, NP), jnp.float32),
        grid_spec=grid_spec,
        compiler_params=pltpu.CompilerParams(dimension_semantics=("parallel",)),
    )(encoder_out, masks, wih_fused, whh_fused, b_fused, wtag_pad, btag_pad)

    # (S, B_pad, NP) -> (B, S, NUM_STATES)
    return jnp.transpose(out, (1, 0, 2))[:B, :, :NUM_STATES]


# ------------------------- pure-JAX reference -------------------------
def reference_forward(encoder_out, entity_mask, verb_mask, params):
    H = HIDDEN

    def masked_mean(mask):
        s = jnp.einsum('bst,bth->bsh', mask, encoder_out)
        cnt = jnp.sum(mask, axis=-1, keepdims=True)
        m = s / cnt
        return jnp.where(jnp.isnan(m), 0.0, m)

    ent = masked_mean(entity_mask)
    vrb = masked_mean(verb_mask)
    concat = jnp.concatenate([ent, vrb], axis=-1)
    allzero = jnp.all(entity_mask == 0, axis=-1, keepdims=True)
    dec_in = jnp.where(allzero, 0.0, concat)                     # (B, S, 4H)

    def lstm_dir(x, wih, whh, b_ih, b_hh, reverse):
        xg = x @ wih.T + b_ih + b_hh                             # (S, 4H)

        def step(carry, g):
            h, c = carry
            g = g + h @ whh.T
            i = jax.nn.sigmoid(g[0:H]); f = jax.nn.sigmoid(g[H:2 * H])
            gg = jnp.tanh(g[2 * H:3 * H]); o = jax.nn.sigmoid(g[3 * H:4 * H])
            c = f * c + i * gg
            h = o * jnp.tanh(c)
            return (h, c), h

        _, hs = lax.scan(step, (jnp.zeros(H), jnp.zeros(H)), xg, reverse=reverse)
        return hs

    def per_example(x):
        hf = lstm_dir(x, params["w_ih_f"], params["w_hh_f"],
                      params["b_ih_f"], params["b_hh_f"], reverse=False)
        hb = lstm_dir(x, params["w_ih_b"], params["w_hh_b"],
                      params["b_ih_b"], params["b_hh_b"], reverse=True)
        return jnp.concatenate([hf, hb], axis=-1)

    dec_out = jax.vmap(per_example)(dec_in)                      # (B, S, 2H)
    return dec_out @ params["w_tag"].T + params["b_tag"]


if __name__ == "__main__":
    B, T, S, H = 2, 16, 8, HIDDEN
    key = jax.random.PRNGKey(0)
    ks = jax.random.split(key, 16)

    bound = 1.0 / math.sqrt(H)
    u = lambda k, shape, b: jax.random.uniform(k, shape, jnp.float32, -b, b)
    xavier_std = math.sqrt(2.0 / (2 * H + NUM_STATES))

    params = {
        "w_ih_f": u(ks[0], (4 * H, 4 * H), bound),
        "w_hh_f": u(ks[1], (4 * H, H), bound),
        "b_ih_f": u(ks[2], (4 * H,), bound),
        "b_hh_f": u(ks[3], (4 * H,), bound),
        "w_ih_b": u(ks[4], (4 * H, 4 * H), bound),
        "w_hh_b": u(ks[5], (4 * H, H), bound),
        "b_ih_b": u(ks[6], (4 * H,), bound),
        "b_hh_b": u(ks[7], (4 * H,), bound),
        "w_tag": jax.random.normal(ks[8], (NUM_STATES, 2 * H), jnp.float32) * xavier_std,
        "b_tag": u(ks[9], (NUM_STATES,), 1.0 / math.sqrt(2 * H)),
    }

    encoder_out = jax.random.normal(ks[10], (B, T, 2 * H), jnp.float32)
    entity_mask = jax.random.bernoulli(ks[11], 0.4, (B, S, T)).astype(jnp.float32)
    verb_mask = jax.random.bernoulli(ks[12], 0.4, (B, S, T)).astype(jnp.float32)
    # force some all-zero rows to exercise the NaN / entity-existence path
    entity_mask = entity_mask.at[0, 2, :].set(0.0).at[1, 5, :].set(0.0)
    verb_mask = verb_mask.at[0, 6, :].set(0.0)

    out = state_tracker_forward(encoder_out, entity_mask, verb_mask, params)
    out = jax.block_until_ready(out)

    ref = reference_forward(encoder_out, entity_mask, verb_mask, params)
    assert out.shape == (B, S, NUM_STATES)
    assert jnp.allclose(out, ref, atol=2e-3, rtol=2e-3), (
        f"max abs err {jnp.max(jnp.abs(out - ref))}")

    print("KERNEL_OK")
</pallas_src>

<mosaic_0001>
module attributes {stable_mosaic.version = 11 : i64} {
  func.func @state_tracker_kernel(%arg0: i32, %arg1: memref<8x16x64xf32, #tpu.memory_space<vmem>>, %arg2: memref<8x16x16xf32, #tpu.memory_space<vmem>>, %arg3: memref<128x256xf32, #tpu.memory_space<vmem>>, %arg4: memref<64x256xf32, #tpu.memory_space<vmem>>, %arg5: memref<1x256xf32, #tpu.memory_space<vmem>>, %arg6: memref<64x128xf32, #tpu.memory_space<vmem>>, %arg7: memref<1x128xf32, #tpu.memory_space<vmem>>, %arg8: memref<8x8x128xf32, #tpu.memory_space<vmem>>, %arg9: memref<8x8x256xf32, #tpu.memory_space<vmem>>, %arg10: memref<8x8x32xf32, #tpu.memory_space<vmem>>, %arg11: memref<8x8x32xf32, #tpu.memory_space<vmem>>) attributes {dimension_semantics = [#tpu.dimension_semantics<parallel>], iteration_bounds = array<i64: 1>, scalar_prefetch = 0 : i64, scratch_operands = 3 : i64, tpu.core_type = #tpu.core_type<tc>, window_params = [{transform_indices = @transform_0, window_bounds = array<i64: 8, 16, 64>}, {transform_indices = @transform_1, window_bounds = array<i64: 8, 16, 16>}, {pipeline_mode = #tpu.pipeline_mode<synchronous>, transform_indices = @transform_2, window_bounds = array<i64: 128, 256>}, {pipeline_mode = #tpu.pipeline_mode<synchronous>, transform_indices = @transform_3, window_bounds = array<i64: 64, 256>}, {pipeline_mode = #tpu.pipeline_mode<synchronous>, transform_indices = @transform_4, window_bounds = array<i64: 1, 256>}, {pipeline_mode = #tpu.pipeline_mode<synchronous>, transform_indices = @transform_5, window_bounds = array<i64: 64, 128>}, {pipeline_mode = #tpu.pipeline_mode<synchronous>, transform_indices = @transform_6, window_bounds = array<i64: 1, 128>}, {transform_indices = @transform_7, window_bounds = array<i64: 8, 8, 128>}]} {
    %c0 = arith.constant 0 : index
    %c0_0 = arith.constant 0 : index
    %c0_1 = arith.constant 0 : index
    %0 = vector.load %arg1[%c0, %c0_0, %c0_1] : memref<8x16x64xf32, #tpu.memory_space<vmem>>, vector<8x16x64xf32>
    %c0_2 = arith.constant 0 : index
    %c0_3 = arith.constant 0 : index
    %c0_4 = arith.constant 0 : index
    %1 = vector.load %arg2[%c0_2, %c0_3, %c0_4] : memref<8x16x16xf32, #tpu.memory_space<vmem>>, vector<8x16x16xf32>
    "tpu.trace_start"() <{level = 10 : i32, message = "bmt,bth->bmh"}> : () -> ()
    %cst = arith.constant dense<0.000000e+00> : vector<8x16x64xf32>
    %2 = tpu.matmul %1, %0, %cst {dimension_numbers = #tpu.dot_dimension_numbers<[2], [1], [1], [2], [0, 0, 0, 1, 1, 2], [0], [0]>} : vector<8x16x16xf32>, vector<8x16x64xf32>, vector<8x16x64xf32> -> vector<8x16x64xf32>
    "tpu.trace_stop"() : () -> ()
    %cst_5 = arith.constant dense<0.000000e+00> : vector<8x16xf32>
    %3 = vector.multi_reduction <add>, %1, %cst_5 [2] : vector<8x16x16xf32> to vector<8x16xf32>
    %4 = vector.shape_cast %3 : vector<8x16xf32> to vector<8x16x1xf32>
    %cst_6 = arith.constant 0.000000e+00 : f32
    %5 = vector.broadcast %cst_6 : f32 to vector<8x16x1xf32>
    %6 = arith.cmpf oeq, %4, %5 : vector<8x16x1xf32>
    %cst_7 = arith.constant 1.000000e+00 : f32
    %7 = vector.broadcast %cst_7 : f32 to vector<8x16x1xf32>
    %8 = arith.select %6, %7, %4 : vector<8x16x1xi1>, vector<8x16x1xf32>
    %9 = vector.broadcast %8 : vector<8x16x1xf32> to vector<8x16x64xf32>
    %10 = arith.divf %2, %9 : vector<8x16x64xf32>
    %11 = vector.extract_strided_slice %10 {offsets = [0, 0, 0], sizes = [8, 8, 64], strides = [1, 1, 1]} : vector<8x16x64xf32> to vector<8x8x64xf32>
    %12 = vector.extract_strided_slice %10 {offsets = [0, 8, 0], sizes = [8, 8, 64], strides = [1, 1, 1]} : vector<8x16x64xf32> to vector<8x8x64xf32>
    %13 = tpu.concatenate %11, %12 in 2 : vector<8x8x64xf32>, vector<8x8x64xf32> -> vector<8x8x128xf32>
    %14 = vector.extract_strided_slice %4 {offsets = [0, 0, 0], sizes = [8, 8, 1], strides = [1, 1, 1]} : vector<8x16x1xf32> to vector<8x8x1xf32>
    %cst_8 = arith.constant 0.000000e+00 : f32
    %15 = vector.broadcast %cst_8 : f32 to vector<8x8x1xf32>
    %16 = arith.cmpf oeq, %14, %15 : vector<8x8x1xf32>
    %cst_9 = arith.constant 0.000000e+00 : f32
    %17 = vector.shape_cast %16 : vector<8x8x1xi1> to vector<8x8x1xi1>
    %18 = vector.broadcast %17 : vector<8x8x1xi1> to vector<8x8x128xi1>
    %19 = vector.broadcast %cst_9 : f32 to vector<8x8x128xf32>
    %20 = arith.select %18, %19, %13 : vector<8x8x128xi1>, vector<8x8x128xf32>
    %21 = vector.shape_cast %20 : vector<8x8x128xf32> to vector<64x128xf32>
    %c0_10 = arith.constant 0 : index
    %c0_11 = arith.constant 0 : index
    %22 = vector.load %arg3[%c0_10, %c0_11] : memref<128x256xf32, #tpu.memory_space<vmem>>, vector<128x256xf32>
    %cst_12 = arith.constant dense<0.000000e+00> : vector<64x256xf32>
    %23 = tpu.matmul %21, %22, %cst_12 {dimension_numbers = #tpu.dot_dimension_numbers<[1], [0], [0], [1], [0, 0, 1, 1], [], []>} : vector<64x128xf32>, vector<128x256xf32>, vector<64x256xf32> -> vector<64x256xf32>
    %c0_13 = arith.constant 0 : index
    %c0_14 = arith.constant 0 : index
    %24 = vector.load %arg5[%c0_13, %c0_14] : memref<1x256xf32, #tpu.memory_space<vmem>>, vector<1x256xf32>
    %25 = vector.broadcast %24 : vector<1x256xf32> to vector<64x256xf32>
    %26 = arith.addf %23, %25 : vector<64x256xf32>
    %27 = vector.shape_cast %26 : vector<64x256xf32> to vector<8x8x256xf32>
    %28 = vector.extract_strided_slice %27 {offsets = [0, 0, 0], sizes = [8, 1, 256], strides = [1, 1, 1]} : vector<8x8x256xf32> to vector<8x1x256xf32>
    %29 = vector.shape_cast %28 : vector<8x1x256xf32> to vector<8x256xf32>
    %c0_15 = arith.constant 0 : index
    %c0_16 = arith.constant 0 : index
    %c0_17 = arith.constant 0 : index
    %30 = vector.load %arg9[%c0_15, %c0_16, %c0_17] : memref<8x8x256xf32, #tpu.memory_space<vmem>>, vector<1x8x256xf32>
    %31 = vector.shape_cast %30 : vector<1x8x256xf32> to vector<8x256xf32>
    %32 = vector.shape_cast %29 : vector<8x256xf32> to vector<1x8x256xf32>
    tpu.vector_store %arg9[%c0_15, %c0_16, %c0_17], %32 {strides = array<i32>} : memref<8x8x256xf32, #tpu.memory_space<vmem>>, vector<1x8x256xf32>,
    %33 = vector.extract_strided_slice %27 {offsets = [0, 1, 0], sizes = [8, 1, 256], strides = [1, 1, 1]} : vector<8x8x256xf32> to vector<8x1x256xf32>
    %34 = vector.shape_cast %33 : vector<8x1x256xf32> to vector<8x256xf32>
    %c1 = arith.constant 1 : index
    %c0_18 = arith.constant 0 : index
    %c0_19 = arith.constant 0 : index
    %35 = vector.load %arg9[%c1, %c0_18, %c0_19] : memref<8x8x256xf32, #tpu.memory_space<vmem>>, vector<1x8x256xf32>
    %36 = vector.shape_cast %35 : vector<1x8x256xf32> to vector<8x256xf32>
    %37 = vector.shape_cast %34 : vector<8x256xf32> to vector<1x8x256xf32>
    tpu.vector_store %arg9[%c1, %c0_18, %c0_19], %37 {strides = array<i32>} : memref<8x8x256xf32, #tpu.memory_space<vmem>>, vector<1x8x256xf32>,
    %38 = vector.extract_strided_slice %27 {offsets = [0, 2, 0], sizes = [8, 1, 256], strides = [1, 1, 1]} : vector<8x8x256xf32> to vector<8x1x256xf32>
    %39 = vector.shape_cast %38 : vector<8x1x256xf32> to vector<8x256xf32>
    %c2 = arith.constant 2 : index
    %c0_20 = arith.constant 0 : index
    %c0_21 = arith.constant 0 : index
    %40 = vector.load %arg9[%c2, %c0_20, %c0_21] : memref<8x8x256xf32, #tpu.memory_space<vmem>>, vector<1x8x256xf32>
    %41 = vector.shape_cast %40 : vector<1x8x256xf32> to vector<8x256xf32>
    %42 = vector.shape_cast %39 : vector<8x256xf32> to vector<1x8x256xf32>
    tpu.vector_store %arg9[%c2, %c0_20, %c0_21], %42 {strides = array<i32>} : memref<8x8x256xf32, #tpu.memory_space<vmem>>, vector<1x8x256xf32>,
    %43 = vector.extract_strided_slice %27 {offsets = [0, 3, 0], sizes = [8, 1, 256], strides = [1, 1, 1]} : vector<8x8x256xf32> to vector<8x1x256xf32>
    %44 = vector.shape_cast %43 : vector<8x1x256xf32> to vector<8x256xf32>
    %c3 = arith.constant 3 : index
    %c0_22 = arith.constant 0 : index
    %c0_23 = arith.constant 0 : index
    %45 = vector.load %arg9[%c3, %c0_22, %c0_23] : memref<8x8x256xf32, #tpu.memory_space<vmem>>, vector<1x8x256xf32>
    %46 = vector.shape_cast %45 : vector<1x8x256xf32> to vector<8x256xf32>
    %47 = vector.shape_cast %44 : vector<8x256xf32> to vector<1x8x256xf32>
    tpu.vector_store %arg9[%c3, %c0_22, %c0_23], %47 {strides = array<i32>} : memref<8x8x256xf32, #tpu.memory_space<vmem>>, vector<1x8x256xf32>,
    %48 = vector.extract_strided_slice %27 {offsets = [0, 4, 0], sizes = [8, 1, 256], strides = [1, 1, 1]} : vector<8x8x256xf32> to vector<8x1x256xf32>
    %49 = vector.shape_cast %48 : vector<8x1x256xf32> to vector<8x256xf32>
    %c4 = arith.constant 4 : index
    %c0_24 = arith.constant 0 : index
    %c0_25 = arith.constant 0 : index
    %50 = vector.load %arg9[%c4, %c0_24, %c0_25] : memref<8x8x256xf32, #tpu.memory_space<vmem>>, vector<1x8x256xf32>
    %51 = vector.shape_cast %50 : vector<1x8x256xf32> to vector<8x256xf32>
    %52 = vector.shape_cast %49 : vector<8x256xf32> to vector<1x8x256xf32>
    tpu.vector_store %arg9[%c4, %c0_24, %c0_25], %52 {strides = array<i32>} : memref<8x8x256xf32, #tpu.memory_space<vmem>>, vector<1x8x256xf32>,
    %53 = vector.extract_strided_slice %27 {offsets = [0, 5, 0], sizes = [8, 1, 256], strides = [1, 1, 1]} : vector<8x8x256xf32> to vector<8x1x256xf32>
    %54 = vector.shape_cast %53 : vector<8x1x256xf32> to vector<8x256xf32>
    %c5 = arith.constant 5 : index
    %c0_26 = arith.constant 0 : index
    %c0_27 = arith.constant 0 : index
    %55 = vector.load %arg9[%c5, %c0_26, %c0_27] : memref<8x8x256xf32, #tpu.memory_space<vmem>>, vector<1x8x256xf32>
    %56 = vector.shape_cast %55 : vector<1x8x256xf32> to vector<8x256xf32>
    %57 = vector.shape_cast %54 : vector<8x256xf32> to vector<1x8x256xf32>
    tpu.vector_store %arg9[%c5, %c0_26, %c0_27], %57 {strides = array<i32>} : memref<8x8x256xf32, #tpu.memory_space<vmem>>, vector<1x8x256xf32>,
    %58 = vector.extract_strided_slice %27 {offsets = [0, 6, 0], sizes = [8, 1, 256], strides = [1, 1, 1]} : vector<8x8x256xf32> to vector<8x1x256xf32>
    %59 = vector.shape_cast %58 : vector<8x1x256xf32> to vector<8x256xf32>
    %c6 = arith.constant 6 : index
    %c0_28 = arith.constant 0 : index
    %c0_29 = arith.constant 0 : index
    %60 = vector.load %arg9[%c6, %c0_28, %c0_29] : memref<8x8x256xf32, #tpu.memory_space<vmem>>, vector<1x8x256xf32>
    %61 = vector.shape_cast %60 : vector<1x8x256xf32> to vector<8x256xf32>
    %62 = vector.shape_cast %59 : vector<8x256xf32> to vector<1x8x256xf32>
    tpu.vector_store %arg9[%c6, %c0_28, %c0_29], %62 {strides = array<i32>} : memref<8x8x256xf32, #tpu.memory_space<vmem>>, vector<1x8x256xf32>,
    %63 = vector.extract_strided_slice %27 {offsets = [0, 7, 0], sizes = [8, 1, 256], strides = [1, 1, 1]} : vector<8x8x256xf32> to vector<8x1x256xf32>
    %64 = vector.shape_cast %63 : vector<8x1x256xf32> to vector<8x256xf32>
    %c7 = arith.constant 7 : index
    %c0_30 = arith.constant 0 : index
    %c0_31 = arith.constant 0 : index
    %65 = vector.load %arg9[%c7, %c0_30, %c0_31] : memref<8x8x256xf32, #tpu.memory_space<vmem>>, vector<1x8x256xf32>
    %66 = vector.shape_cast %65 : vector<1x8x256xf32> to vector<8x256xf32>
    %67 = vector.shape_cast %64 : vector<8x256xf32> to vector<1x8x256xf32>
    tpu.vector_store %arg9[%c7, %c0_30, %c0_31], %67 {strides = array<i32>} : memref<8x8x256xf32, #tpu.memory_space<vmem>>, vector<1x8x256xf32>,
    %68 = tpu.iota {dimensions = array<i32: 1>} : vector<8x256xi32>
    %c64_i32 = arith.constant 64 : i32
    %c0_i32 = arith.constant 0 : i32
    %69 = arith.cmpi eq, %c64_i32, %c0_i32 : i32
    %c1_i32 = arith.constant 1 : i32
    %70 = arith.select %69, %c1_i32, %c64_i32 : i32
    %71 = vector.broadcast %70 : i32 to vector<8x256xi32>
    %72 = arith.remsi %68, %71 : vector<8x256xi32>
    %c0_i32_32 = arith.constant 0 : i32
    %73 = vector.broadcast %c0_i32_32 : i32 to vector<8x256xi32>
    %74 = arith.cmpi ne, %72, %73 : vector<8x256xi32>
    %c0_i32_33 = arith.constant 0 : i32
    %75 = vector.broadcast %c0_i32_33 : i32 to vector<8x256xi32>
    %76 = arith.cmpi slt, %72, %75 : vector<8x256xi32>
    %c0_i32_34 = arith.constant 0 : i32
    %77 = arith.cmpi slt, %70, %c0_i32_34 : i32
    %78 = vector.broadcast %77 : i1 to vector<8x256xi1>
    %79 = vector.broadcast %78 : vector<8x256xi1> to vector<8x256xi1>
    %80 = arith.xori %76, %79 : vector<8x256xi1>
    %81 = arith.andi %80, %74 : vector<8x256xi1>
    %82 = vector.broadcast %70 : i32 to vector<8x256xi32>
    %83 = arith.addi %72, %82 : vector<8x256xi32>
    %84 = arith.select %81, %83, %72 : vector<8x256xi1>, vector<8x256xi32>
    %c32_i32 = arith.constant 32 : i32
    %85 = vector.broadcast %c32_i32 : i32 to vector<8x256xi32>
    %86 = arith.cmpi slt, %84, %85 : vector<8x256xi32>
    %c128_i32 = arith.constant 128 : i32
    %87 = vector.broadcast %c128_i32 : i32 to vector<8x256xi32>
    %88 = arith.cmpi sge, %68, %87 : vector<8x256xi32>
    %c192_i32 = arith.constant 192 : i32
    %89 = vector.broadcast %c192_i32 : i32 to vector<8x256xi32>
    %90 = arith.cmpi slt, %68, %89 : vector<8x256xi32>
    %91 = arith.andi %88, %90 : vector<8x256xi1>
    %c0_35 = arith.constant 0 : index
    %c0_36 = arith.constant 0 : index
    %92 = vector.load %arg4[%c0_35, %c0_36] : memref<64x256xf32, #tpu.memory_space<vmem>>, vector<64x256xf32>
    %cst_37 = arith.constant 0.000000e+00 : f32
    %93 = vector.broadcast %cst_37 : f32 to vector<8x64xf32>
    %cst_38 = arith.constant 0.000000e+00 : f32
    %94 = vector.broadcast %cst_38 : f32 to vector<8x64xf32>
    %c0_39 = arith.constant 0 : index
    %c0_40 = arith.constant 0 : index
    %c0_41 = arith.constant 0 : index
    %95 = vector.load %arg9[%c0_39, %c0_40, %c0_41] : memref<8x8x256xf32, #tpu.memory_space<vmem>>, vector<1x8x256xf32>
    %96 = vector.shape_cast %95 : vector<1x8x256xf32> to vector<8x256xf32>
    %c7_42 = arith.constant 7 : index
    %c0_43 = arith.constant 0 : index
    %c0_44 = arith.constant 0 : index
    %97 = vector.load %arg9[%c7_42, %c0_43, %c0_44] : memref<8x8x256xf32, #tpu.memory_space<vmem>>, vector<1x8x256xf32>
    %98 = vector.shape_cast %97 : vector<1x8x256xf32> to vector<8x256xf32>
    %99 = arith.select %86, %96, %98 : vector<8x256xi1>, vector<8x256xf32>
    %cst_45 = arith.constant dense<0.000000e+00> : vector<8x256xf32>
    %100 = tpu.matmul %93, %92, %cst_45 {dimension_numbers = #tpu.dot_dimension_numbers<[1], [0], [0], [1], [0, 0, 1, 1], [], []>} : vector<8x64xf32>, vector<64x256xf32>, vector<8x256xf32> -> vector<8x256xf32>
    %101 = arith.addf %99, %100 : vector<8x256xf32>
    %102 = math.tanh %101 : vector<8x256xf32>
    %103 = arith.negf %101 : vector<8x256xf32>
    %104 = math.exp %103 : vector<8x256xf32>
    %cst_46 = arith.constant 1.000000e+00 : f32
    %105 = vector.broadcast %cst_46 : f32 to vector<8x256xf32>
    %106 = arith.addf %105, %104 : vector<8x256xf32>
    %107 = arith.divf %105, %106 : vector<8x256xf32>
    %108 = arith.select %91, %102, %107 : vector<8x256xi1>, vector<8x256xf32>
    %109 = vector.extract_strided_slice %108 {offsets = [0, 0], sizes = [8, 64], strides = [1, 1]} : vector<8x256xf32> to vector<8x64xf32>
    %110 = vector.extract_strided_slice %108 {offsets = [0, 64], sizes = [8, 64], strides = [1, 1]} : vector<8x256xf32> to vector<8x64xf32>
    %111 = vector.extract_strided_slice %108 {offsets = [0, 128], sizes = [8, 64], strides = [1, 1]} : vector<8x256xf32> to vector<8x64xf32>
    %112 = vector.extract_strided_slice %108 {offsets = [0, 192], sizes = [8, 64], strides = [1, 1]} : vector<8x256xf32> to vector<8x64xf32>
    %113 = arith.mulf %110, %94 : vector<8x64xf32>
    %114 = arith.mulf %109, %111 : vector<8x64xf32>
    %115 = arith.addf %113, %114 : vector<8x64xf32>
    %116 = math.tanh %115 : vector<8x64xf32>
    %117 = arith.mulf %112, %116 : vector<8x64xf32>
    %118 = vector.extract_strided_slice %117 {offsets = [0, 0], sizes = [8, 32], strides = [1, 1]} : vector<8x64xf32> to vector<8x32xf32>
    %c0_47 = arith.constant 0 : index
    %c0_48 = arith.constant 0 : index
    %c0_49 = arith.constant 0 : index
    %119 = vector.load %arg10[%c0_47, %c0_48, %c0_49] : memref<8x8x32xf32, #tpu.memory_space<vmem>>, vector<1x8x32xf32>
    %120 = vector.shape_cast %119 : vector<1x8x32xf32> to vector<8x32xf32>
    %121 = vector.shape_cast %118 : vector<8x32xf32> to vector<1x8x32xf32>
    tpu.vector_store %arg10[%c0_47, %c0_48, %c0_49], %121 {strides = array<i32>} : memref<8x8x32xf32, #tpu.memory_space<vmem>>, vector<1x8x32xf32>,
    %122 = vector.extract_strided_slice %117 {offsets = [0, 32], sizes = [8, 32], strides = [1, 1]} : vector<8x64xf32> to vector<8x32xf32>
    %c7_50 = arith.constant 7 : index
    %c0_51 = arith.constant 0 : index
    %c0_52 = arith.constant 0 : index
    %123 = vector.load %arg11[%c7_50, %c0_51, %c0_52] : memref<8x8x32xf32, #tpu.memory_space<vmem>>, vector<1x8x32xf32>
    %124 = vector.shape_cast %123 : vector<1x8x32xf32> to vector<8x32xf32>
    %125 = vector.shape_cast %122 : vector<8x32xf32> to vector<1x8x32xf32>
    tpu.vector_store %arg11[%c7_50, %c0_51, %c0_52], %125 {strides = array<i32>} : memref<8x8x32xf32, #tpu.memory_space<vmem>>, vector<1x8x32xf32>,
    %c1_53 = arith.constant 1 : index
    %c0_54 = arith.constant 0 : index
    %c0_55 = arith.constant 0 : index
    %126 = vector.load %arg9[%c1_53, %c0_54, %c0_55] : memref<8x8x256xf32, #tpu.memory_space<vmem>>, vector<1x8x256xf32>
    %127 = vector.shape_cast %126 : vector<1x8x256xf32> to vector<8x256xf32>
    %c6_56 = arith.constant 6 : index
    %c0_57 = arith.constant 0 : index
    %c0_58 = arith.constant 0 : index
    %128 = vector.load %arg9[%c6_56, %c0_57, %c0_58] : memref<8x8x256xf32, #tpu.memory_space<vmem>>, vector<1x8x256xf32>
    %129 = vector.shape_cast %128 : vector<1x8x256xf32> to vector<8x256xf32>
    %130 = arith.select %86, %127, %129 : vector<8x256xi1>, vector<8x256xf32>
    %cst_59 = arith.constant dense<0.000000e+00> : vector<8x256xf32>
    %131 = tpu.matmul %117, %92, %cst_59 {dimension_numbers = #tpu.dot_dimension_numbers<[1], [0], [0], [1], [0, 0, 1, 1], [], []>} : vector<8x64xf32>, vector<64x256xf32>, vector<8x256xf32> -> vector<8x256xf32>
    %132 = arith.addf %130, %131 : vector<8x256xf32>
    %133 = math.tanh %132 : vector<8x256xf32>
    %134 = arith.negf %132 : vector<8x256xf32>
    %135 = math.exp %134 : vector<8x256xf32>
    %cst_60 = arith.constant 1.000000e+00 : f32
    %136 = vector.broadcast %cst_60 : f32 to vector<8x256xf32>
    %137 = arith.addf %136, %135 : vector<8x256xf32>
    %138 = arith.divf %136, %137 : vector<8x256xf32>
    %139 = arith.select %91, %133, %138 : vector<8x256xi1>, vector<8x256xf32>
    %140 = vector.extract_strided_slice %139 {offsets = [0, 0], sizes = [8, 64], strides = [1, 1]} : vector<8x256xf32> to vector<8x64xf32>
    %141 = vector.extract_strided_slice %139 {offsets = [0, 64], sizes = [8, 64], strides = [1, 1]} : vector<8x256xf32> to vector<8x64xf32>
    %142 = vector.extract_strided_slice %139 {offsets = [0, 128], sizes = [8, 64], strides = [1, 1]} : vector<8x256xf32> to vector<8x64xf32>
    %143 = vector.extract_strided_slice %139 {offsets = [0, 192], sizes = [8, 64], strides = [1, 1]} : vector<8x256xf32> to vector<8x64xf32>
    %144 = arith.mulf %141, %115 : vector<8x64xf32>
    %145 = arith.mulf %140, %142 : vector<8x64xf32>
    %146 = arith.addf %144, %145 : vector<8x64xf32>
    %147 = math.tanh %146 : vector<8x64xf32>
    %148 = arith.mulf %143, %147 : vector<8x64xf32>
    %149 = vector.extract_strided_slice %148 {offsets = [0, 0], sizes = [8, 32], strides = [1, 1]} : vector<8x64xf32> to vector<8x32xf32>
    %c1_61 = arith.constant 1 : index
    %c0_62 = arith.constant 0 : index
    %c0_63 = arith.constant 0 : index
    %150 = vector.load %arg10[%c1_61, %c0_62, %c0_63] : memref<8x8x32xf32, #tpu.memory_space<vmem>>, vector<1x8x32xf32>
    %151 = vector.shape_cast %150 : vector<1x8x32xf32> to vector<8x32xf32>
    %152 = vector.shape_cast %149 : vector<8x32xf32> to vector<1x8x32xf32>
    tpu.vector_store %arg10[%c1_61, %c0_62, %c0_63], %152 {strides = array<i32>} : memref<8x8x32xf32, #tpu.memory_space<vmem>>, vector<1x8x32xf32>,
    %153 = vector.extract_strided_slice %148 {offsets = [0, 32], sizes = [8, 32], strides = [1, 1]} : vector<8x64xf32> to vector<8x32xf32>
    %c6_64 = arith.constant 6 : index
    %c0_65 = arith.constant 0 : index
    %c0_66 = arith.constant 0 : index
    %154 = vector.load %arg11[%c6_64, %c0_65, %c0_66] : memref<8x8x32xf32, #tpu.memory_space<vmem>>, vector<1x8x32xf32>
    %155 = vector.shape_cast %154 : vector<1x8x32xf32> to vector<8x32xf32>
    %156 = vector.shape_cast %153 : vector<8x32xf32> to vector<1x8x32xf32>
    tpu.vector_store %arg11[%c6_64, %c0_65, %c0_66], %156 {strides = array<i32>} : memref<8x8x32xf32, #tpu.memory_space<vmem>>, vector<1x8x32xf32>,
    %c2_67 = arith.constant 2 : index
    %c0_68 = arith.constant 0 : index
    %c0_69 = arith.constant 0 : index
    %157 = vector.load %arg9[%c2_67, %c0_68, %c0_69] : memref<8x8x256xf32, #tpu.memory_space<vmem>>, vector<1x8x256xf32>
    %158 = vector.shape_cast %157 : vector<1x8x256xf32> to vector<8x256xf32>
    %c5_70 = arith.constant 5 : index
    %c0_71 = arith.constant 0 : index
    %c0_72 = arith.constant 0 : index
    %159 = vector.load %arg9[%c5_70, %c0_71, %c0_72] : memref<8x8x256xf32, #tpu.memory_space<vmem>>, vector<1x8x256xf32>
    %160 = vector.shape_cast %159 : vector<1x8x256xf32> to vector<8x256xf32>
    %161 = arith.select %86, %158, %160 : vector<8x256xi1>, vector<8x256xf32>
    %cst_73 = arith.constant dense<0.000000e+00> : vector<8x256xf32>
    %162 = tpu.matmul %148, %92, %cst_73 {dimension_numbers = #tpu.dot_dimension_numbers<[1], [0], [0], [1], [0, 0, 1, 1], [], []>} : vector<8x64xf32>, vector<64x256xf32>, vector<8x256xf32> -> vector<8x256xf32>
    %163 = arith.addf %161, %162 : vector<8x256xf32>
    %164 = math.tanh %163 : vector<8x256xf32>
    %165 = arith.negf %163 : vector<8x256xf32>
    %166 = math.exp %165 : vector<8x256xf32>
    %cst_74 = arith.constant 1.000000e+00 : f32
    %167 = vector.broadcast %cst_74 : f32 to vector<8x256xf32>
    %168 = arith.addf %167, %166 : vector<8x256xf32>
    %169 = arith.divf %167, %168 : vector<8x256xf32>
    %170 = arith.select %91, %164, %169 : vector<8x256xi1>, vector<8x256xf32>
    %171 = vector.extract_strided_slice %170 {offsets = [0, 0], sizes = [8, 64], strides = [1, 1]} : vector<8x256xf32> to vector<8x64xf32>
    %172 = vector.extract_strided_slice %170 {offsets = [0, 64], sizes = [8, 64], strides = [1, 1]} : vector<8x256xf32> to vector<8x64xf32>
    %173 = vector.extract_strided_slice %170 {offsets = [0, 128], sizes = [8, 64], strides = [1, 1]} : vector<8x256xf32> to vector<8x64xf32>
    %174 = vector.extract_strided_slice %170 {offsets = [0, 192], sizes = [8, 64], strides = [1, 1]} : vector<8x256xf32> to vector<8x64xf32>
    %175 = arith.mulf %172, %146 : vector<8x64xf32>
    %176 = arith.mulf %171, %173 : vector<8x64xf32>
    %177 = arith.addf %175, %176 : vector<8x64xf32>
    %178 = math.tanh %177 : vector<8x64xf32>
    %179 = arith.mulf %174, %178 : vector<8x64xf32>
    %180 = vector.extract_strided_slice %179 {offsets = [0, 0], sizes = [8, 32], strides = [1, 1]} : vector<8x64xf32> to vector<8x32xf32>
    %c2_75 = arith.constant 2 : index
    %c0_76 = arith.constant 0 : index
    %c0_77 = arith.constant 0 : index
    %181 = vector.load %arg10[%c2_75, %c0_76, %c0_77] : memref<8x8x32xf32, #tpu.memory_space<vmem>>, vector<1x8x32xf32>
    %182 = vector.shape_cast %181 : vector<1x8x32xf32> to vector<8x32xf32>
    %183 = vector.shape_cast %180 : vector<8x32xf32> to vector<1x8x32xf32>
    tpu.vector_store %arg10[%c2_75, %c0_76, %c0_77], %183 {strides = array<i32>} : memref<8x8x32xf32, #tpu.memory_space<vmem>>, vector<1x8x32xf32>,
    %184 = vector.extract_strided_slice %179 {offsets = [0, 32], sizes = [8, 32], strides = [1, 1]} : vector<8x64xf32> to vector<8x32xf32>
    %c5_78 = arith.constant 5 : index
    %c0_79 = arith.constant 0 : index
    %c0_80 = arith.constant 0 : index
    %185 = vector.load %arg11[%c5_78, %c0_79, %c0_80] : memref<8x8x32xf32, #tpu.memory_space<vmem>>, vector<1x8x32xf32>
    %186 = vector.shape_cast %185 : vector<1x8x32xf32> to vector<8x32xf32>
    %187 = vector.shape_cast %184 : vector<8x32xf32> to vector<1x8x32xf32>
    tpu.vector_store %arg11[%c5_78, %c0_79, %c0_80], %187 {strides = array<i32>} : memref<8x8x32xf32, #tpu.memory_space<vmem>>, vector<1x8x32xf32>,
    %c3_81 = arith.constant 3 : index
    %c0_82 = arith.constant 0 : index
    %c0_83 = arith.constant 0 : index
    %188 = vector.load %arg9[%c3_81, %c0_82, %c0_83] : memref<8x8x256xf32, #tpu.memory_space<vmem>>, vector<1x8x256xf32>
    %189 = vector.shape_cast %188 : vector<1x8x256xf32> to vector<8x256xf32>
    %c4_84 = arith.constant 4 : index
    %c0_85 = arith.constant 0 : index
    %c0_86 = arith.constant 0 : index
    %190 = vector.load %arg9[%c4_84, %c0_85, %c0_86] : memref<8x8x256xf32, #tpu.memory_space<vmem>>, vector<1x8x256xf32>
    %191 = vector.shape_cast %190 : vector<1x8x256xf32> to vector<8x256xf32>
    %192 = arith.select %86, %189, %191 : vector<8x256xi1>, vector<8x256xf32>
    %cst_87 = arith.constant dense<0.000000e+00> : vector<8x256xf32>
    %193 = tpu.matmul %179, %92, %cst_87 {dimension_numbers = #tpu.dot_dimension_numbers<[1], [0], [0], [1], [0, 0, 1, 1], [], []>} : vector<8x64xf32>, vector<64x256xf32>, vector<8x256xf32> -> vector<8x256xf32>
    %194 = arith.addf %192, %193 : vector<8x256xf32>
    %195 = math.tanh %194 : vector<8x256xf32>
    %196 = arith.negf %194 : vector<8x256xf32>
    %197 = math.exp %196 : vector<8x256xf32>
    %cst_88 = arith.constant 1.000000e+00 : f32
    %198 = vector.broadcast %cst_88 : f32 to vector<8x256xf32>
    %199 = arith.addf %198, %197 : vector<8x256xf32>
    %200 = arith.divf %198, %199 : vector<8x256xf32>
    %201 = arith.select %91, %195, %200 : vector<8x256xi1>, vector<8x256xf32>
    %202 = vector.extract_strided_slice %201 {offsets = [0, 0], sizes = [8, 64], strides = [1, 1]} : vector<8x256xf32> to vector<8x64xf32>
    %203 = vector.extract_strided_slice %201 {offsets = [0, 64], sizes = [8, 64], strides = [1, 1]} : vector<8x256xf32> to vector<8x64xf32>
    %204 = vector.extract_strided_slice %201 {offsets = [0, 128], sizes = [8, 64], strides = [1, 1]} : vector<8x256xf32> to vector<8x64xf32>
    %205 = vector.extract_strided_slice %201 {offsets = [0, 192], sizes = [8, 64], strides = [1, 1]} : vector<8x256xf32> to vector<8x64xf32>
    %206 = arith.mulf %203, %177 : vector<8x64xf32>
    %207 = arith.mulf %202, %204 : vector<8x64xf32>
    %208 = arith.addf %206, %207 : vector<8x64xf32>
    %209 = math.tanh %208 : vector<8x64xf32>
    %210 = arith.mulf %205, %209 : vector<8x64xf32>
    %211 = vector.extract_strided_slice %210 {offsets = [0, 0], sizes = [8, 32], strides = [1, 1]} : vector<8x64xf32> to vector<8x32xf32>
    %c3_89 = arith.constant 3 : index
    %c0_90 = arith.constant 0 : index
    %c0_91 = arith.constant 0 : index
    %212 = vector.load %arg10[%c3_89, %c0_90, %c0_91] : memref<8x8x32xf32, #tpu.memory_space<vmem>>, vector<1x8x32xf32>
    %213 = vector.shape_cast %212 : vector<1x8x32xf32> to vector<8x32xf32>
    %214 = vector.shape_cast %211 : vector<8x32xf32> to vector<1x8x32xf32>
    tpu.vector_store %arg10[%c3_89, %c0_90, %c0_91], %214 {strides = array<i32>} : memref<8x8x32xf32, #tpu.memory_space<vmem>>, vector<1x8x32xf32>,
    %215 = vector.extract_strided_slice %210 {offsets = [0, 32], sizes = [8, 32], strides = [1, 1]} : vector<8x64xf32> to vector<8x32xf32>
    %c4_92 = arith.constant 4 : index
    %c0_93 = arith.constant 0 : index
    %c0_94 = arith.constant 0 : index
    %216 = vector.load %arg11[%c4_92, %c0_93, %c0_94] : memref<8x8x32xf32, #tpu.memory_space<vmem>>, vector<1x8x32xf32>
    %217 = vector.shape_cast %216 : vector<1x8x32xf32> to vector<8x32xf32>
    %218 = vector.shape_cast %215 : vector<8x32xf32> to vector<1x8x32xf32>
    tpu.vector_store %arg11[%c4_92, %c0_93, %c0_94], %218 {strides = array<i32>} : memref<8x8x32xf32, #tpu.memory_space<vmem>>, vector<1x8x32xf32>,
    %c4_95 = arith.constant 4 : index
    %c0_96 = arith.constant 0 : index
    %c0_97 = arith.constant 0 : index
    %219 = vector.load %arg9[%c4_95, %c0_96, %c0_97] : memref<8x8x256xf32, #tpu.memory_space<vmem>>, vector<1x8x256xf32>
    %220 = vector.shape_cast %219 : vector<1x8x256xf32> to vector<8x256xf32>
    %c3_98 = arith.constant 3 : index
    %c0_99 = arith.constant 0 : index
    %c0_100 = arith.constant 0 : index
    %221 = vector.load %arg9[%c3_98, %c0_99, %c0_100] : memref<8x8x256xf32, #tpu.memory_space<vmem>>, vector<1x8x256xf32>
    %222 = vector.shape_cast %221 : vector<1x8x256xf32> to vector<8x256xf32>
    %223 = arith.select %86, %220, %222 : vector<8x256xi1>, vector<8x256xf32>
    %cst_101 = arith.constant dense<0.000000e+00> : vector<8x256xf32>
    %224 = tpu.matmul %210, %92, %cst_101 {dimension_numbers = #tpu.dot_dimension_numbers<[1], [0], [0], [1], [0, 0, 1, 1], [], []>} : vector<8x64xf32>, vector<64x256xf32>, vector<8x256xf32> -> vector<8x256xf32>
    %225 = arith.addf %223, %224 : vector<8x256xf32>
    %226 = math.tanh %225 : vector<8x256xf32>
    %227 = arith.negf %225 : vector<8x256xf32>
    %228 = math.exp %227 : vector<8x256xf32>
    %cst_102 = arith.constant 1.000000e+00 : f32
    %229 = vector.broadcast %cst_102 : f32 to vector<8x256xf32>
    %230 = arith.addf %229, %228 : vector<8x256xf32>
    %231 = arith.divf %229, %230 : vector<8x256xf32>
    %232 = arith.select %91, %226, %231 : vector<8x256xi1>, vector<8x256xf32>
    %233 = vector.extract_strided_slice %232 {offsets = [0, 0], sizes = [8, 64], strides = [1, 1]} : vector<8x256xf32> to vector<8x64xf32>
    %234 = vector.extract_strided_slice %232 {offsets = [0, 64], sizes = [8, 64], strides = [1, 1]} : vector<8x256xf32> to vector<8x64xf32>
    %235 = vector.extract_strided_slice %232 {offsets = [0, 128], sizes = [8, 64], strides = [1, 1]} : vector<8x256xf32> to vector<8x64xf32>
    %236 = vector.extract_strided_slice %232 {offsets = [0, 192], sizes = [8, 64], strides = [1, 1]} : vector<8x256xf32> to vector<8x64xf32>
    %237 = arith.mulf %234, %208 : vector<8x64xf32>
    %238 = arith.mulf %233, %235 : vector<8x64xf32>
    %239 = arith.addf %237, %238 : vector<8x64xf32>
    %240 = math.tanh %239 : vector<8x64xf32>
    %241 = arith.mulf %236, %240 : vector<8x64xf32>
    %242 = vector.extract_strided_slice %241 {offsets = [0, 0], sizes = [8, 32], strides = [1, 1]} : vector<8x64xf32> to vector<8x32xf32>
    %c4_103 = arith.constant 4 : index
    %c0_104 = arith.constant 0 : index
    %c0_105 = arith.constant 0 : index
    %243 = vector.load %arg10[%c4_103, %c0_104, %c0_105] : memref<8x8x32xf32, #tpu.memory_space<vmem>>, vector<1x8x32xf32>
    %244 = vector.shape_cast %243 : vector<1x8x32xf32> to vector<8x32xf32>
    %245 = vector.shape_cast %242 : vector<8x32xf32> to vector<1x8x32xf32>
    tpu.vector_store %arg10[%c4_103, %c0_104, %c0_105], %245 {strides = array<i32>} : memref<8x8x32xf32, #tpu.memory_space<vmem>>, vector<1x8x32xf32>,
    %246 = vector.extract_strided_slice %241 {offsets = [0, 32], sizes = [8, 32], strides = [1, 1]} : vector<8x64xf32> to vector<8x32xf32>
    %c3_106 = arith.constant 3 : index
    %c0_107 = arith.constant 0 : index
    %c0_108 = arith.constant 0 : index
    %247 = vector.load %arg11[%c3_106, %c0_107, %c0_108] : memref<8x8x32xf32, #tpu.memory_space<vmem>>, vector<1x8x32xf32>
    %248 = vector.shape_cast %247 : vector<1x8x32xf32> to vector<8x32xf32>
    %249 = vector.shape_cast %246 : vector<8x32xf32> to vector<1x8x32xf32>
    tpu.vector_store %arg11[%c3_106, %c0_107, %c0_108], %249 {strides = array<i32>} : memref<8x8x32xf32, #tpu.memory_space<vmem>>, vector<1x8x32xf32>,
    %c5_109 = arith.constant 5 : index
    %c0_110 = arith.constant 0 : index
    %c0_111 = arith.constant 0 : index
    %250 = vector.load %arg9[%c5_109, %c0_110, %c0_111] : memref<8x8x256xf32, #tpu.memory_space<vmem>>, vector<1x8x256xf32>
    %251 = vector.shape_cast %250 : vector<1x8x256xf32> to vector<8x256xf32>
    %c2_112 = arith.constant 2 : index
    %c0_113 = arith.constant 0 : index
    %c0_114 = arith.constant 0 : index
    %252 = vector.load %arg9[%c2_112, %c0_113, %c0_114] : memref<8x8x256xf32, #tpu.memory_space<vmem>>, vector<1x8x256xf32>
    %253 = vector.shape_cast %252 : vector<1x8x256xf32> to vector<8x256xf32>
    %254 = arith.select %86, %251, %253 : vector<8x256xi1>, vector<8x256xf32>
    %cst_115 = arith.constant dense<0.000000e+00> : vector<8x256xf32>
    %255 = tpu.matmul %241, %92, %cst_115 {dimension_numbers = #tpu.dot_dimension_numbers<[1], [0], [0], [1], [0, 0, 1, 1], [], []>} : vector<8x64xf32>, vector<64x256xf32>, vector<8x256xf32> -> vector<8x256xf32>
    %256 = arith.addf %254, %255 : vector<8x256xf32>
    %257 = math.tanh %256 : vector<8x256xf32>
    %258 = arith.negf %256 : vector<8x256xf32>
    %259 = math.exp %258 : vector<8x256xf32>
    %cst_116 = arith.constant 1.000000e+00 : f32
    %260 = vector.broadcast %cst_116 : f32 to vector<8x256xf32>
    %261 = arith.addf %260, %259 : vector<8x256xf32>
    %262 = arith.divf %260, %261 : vector<8x256xf32>
    %263 = arith.select %91, %257, %262 : vector<8x256xi1>, vector<8x256xf32>
    %264 = vector.extract_strided_slice %263 {offsets = [0, 0], sizes = [8, 64], strides = [1, 1]} : vector<8x256xf32> to vector<8x64xf32>
    %265 = vector.extract_strided_slice %263 {offsets = [0, 64], sizes = [8, 64], strides = [1, 1]} : vector<8x256xf32> to vector<8x64xf32>
    %266 = vector.extract_strided_slice %263 {offsets = [0, 128], sizes = [8, 64], strides = [1, 1]} : vector<8x256xf32> to vector<8x64xf32>
    %267 = vector.extract_strided_slice %263 {offsets = [0, 192], sizes = [8, 64], strides = [1, 1]} : vector<8x256xf32> to vector<8x64xf32>
    %268 = arith.mulf %265, %239 : vector<8x64xf32>
    %269 = arith.mulf %264, %266 : vector<8x64xf32>
    %270 = arith.addf %268, %269 : vector<8x64xf32>
    %271 = math.tanh %270 : vector<8x64xf32>
    %272 = arith.mulf %267, %271 : vector<8x64xf32>
    %273 = vector.extract_strided_slice %272 {offsets = [0, 0], sizes = [8, 32], strides = [1, 1]} : vector<8x64xf32> to vector<8x32xf32>
    %c5_117 = arith.constant 5 : index
    %c0_118 = arith.constant 0 : index
    %c0_119 = arith.constant 0 : index
    %274 = vector.load %arg10[%c5_117, %c0_118, %c0_119] : memref<8x8x32xf32, #tpu.memory_space<vmem>>, vector<1x8x32xf32>
    %275 = vector.shape_cast %274 : vector<1x8x32xf32> to vector<8x32xf32>
    %276 = vector.shape_cast %273 : vector<8x32xf32> to vector<1x8x32xf32>
    tpu.vector_store %arg10[%c5_117, %c0_118, %c0_119], %276 {strides = array<i32>} : memref<8x8x32xf32, #tpu.memory_space<vmem>>, vector<1x8x32xf32>,
    %277 = vector.extract_strided_slice %272 {offsets = [0, 32], sizes = [8, 32], strides = [1, 1]} : vector<8x64xf32> to vector<8x32xf32>
    %c2_120 = arith.constant 2 : index
    %c0_121 = arith.constant 0 : index
    %c0_122 = arith.constant 0 : index
    %278 = vector.load %arg11[%c2_120, %c0_121, %c0_122] : memref<8x8x32xf32, #tpu.memory_space<vmem>>, vector<1x8x32xf32>
    %279 = vector.shape_cast %278 : vector<1x8x32xf32> to vector<8x32xf32>
    %280 = vector.shape_cast %277 : vector<8x32xf32> to vector<1x8x32xf32>
    tpu.vector_store %arg11[%c2_120, %c0_121, %c0_122], %280 {strides = array<i32>} : memref<8x8x32xf32, #tpu.memory_space<vmem>>, vector<1x8x32xf32>,
    %c6_123 = arith.constant 6 : index
    %c0_124 = arith.constant 0 : index
    %c0_125 = arith.constant 0 : index
    %281 = vector.load %arg9[%c6_123, %c0_124, %c0_125] : memref<8x8x256xf32, #tpu.memory_space<vmem>>, vector<1x8x256xf32>
    %282 = vector.shape_cast %281 : vector<1x8x256xf32> to vector<8x256xf32>
    %c1_126 = arith.constant 1 : index
    %c0_127 = arith.constant 0 : index
    %c0_128 = arith.constant 0 : index
    %283 = vector.load %arg9[%c1_126, %c0_127, %c0_128] : memref<8x8x256xf32, #tpu.memory_space<vmem>>, vector<1x8x256xf32>
    %284 = vector.shape_cast %283 : vector<1x8x256xf32> to vector<8x256xf32>
    %285 = arith.select %86, %282, %284 : vector<8x256xi1>, vector<8x256xf32>
    %cst_129 = arith.constant dense<0.000000e+00> : vector<8x256xf32>
    %286 = tpu.matmul %272, %92, %cst_129 {dimension_numbers = #tpu.dot_dimension_numbers<[1], [0], [0], [1], [0, 0, 1, 1], [], []>} : vector<8x64xf32>, vector<64x256xf32>, vector<8x256xf32> -> vector<8x256xf32>
    %287 = arith.addf %285, %286 : vector<8x256xf32>
    %288 = math.tanh %287 : vector<8x256xf32>
    %289 = arith.negf %287 : vector<8x256xf32>
    %290 = math.exp %289 : vector<8x256xf32>
    %cst_130 = arith.constant 1.000000e+00 : f32
    %291 = vector.broadcast %cst_130 : f32 to vector<8x256xf32>
    %292 = arith.addf %291, %290 : vector<8x256xf32>
    %293 = arith.divf %291, %292 : vector<8x256xf32>
    %294 = arith.select %91, %288, %293 : vector<8x256xi1>, vector<8x256xf32>
    %295 = vector.extract_strided_slice %294 {offsets = [0, 0], sizes = [8, 64], strides = [1, 1]} : vector<8x256xf32> to vector<8x64xf32>
    %296 = vector.extract_strided_slice %294 {offsets = [0, 64], sizes = [8, 64], strides = [1, 1]} : vector<8x256xf32> to vector<8x64xf32>
    %297 = vector.extract_strided_slice %294 {offsets = [0, 128], sizes = [8, 64], strides = [1, 1]} : vector<8x256xf32> to vector<8x64xf32>
    %298 = vector.extract_strided_slice %294 {offsets = [0, 192], sizes = [8, 64], strides = [1, 1]} : vector<8x256xf32> to vector<8x64xf32>
    %299 = arith.mulf %296, %270 : vector<8x64xf32>
    %300 = arith.mulf %295, %297 : vector<8x64xf32>
    %301 = arith.addf %299, %300 : vector<8x64xf32>
    %302 = math.tanh %301 : vector<8x64xf32>
    %303 = arith.mulf %298, %302 : vector<8x64xf32>
    %304 = vector.extract_strided_slice %303 {offsets = [0, 0], sizes = [8, 32], strides = [1, 1]} : vector<8x64xf32> to vector<8x32xf32>
    %c6_131 = arith.constant 6 : index
    %c0_132 = arith.constant 0 : index
    %c0_133 = arith.constant 0 : index
    %305 = vector.load %arg10[%c6_131, %c0_132, %c0_133] : memref<8x8x32xf32, #tpu.memory_space<vmem>>, vector<1x8x32xf32>
    %306 = vector.shape_cast %305 : vector<1x8x32xf32> to vector<8x32xf32>
    %307 = vector.shape_cast %304 : vector<8x32xf32> to vector<1x8x32xf32>
    tpu.vector_store %arg10[%c6_131, %c0_132, %c0_133], %307 {strides = array<i32>} : memref<8x8x32xf32, #tpu.memory_space<vmem>>, vector<1x8x32xf32>,
    %308 = vector.extract_strided_slice %303 {offsets = [0, 32], sizes = [8, 32], strides = [1, 1]} : vector<8x64xf32> to vector<8x32xf32>
    %c1_134 = arith.constant 1 : index
    %c0_135 = arith.constant 0 : index
    %c0_136 = arith.constant 0 : index
    %309 = vector.load %arg11[%c1_134, %c0_135, %c0_136] : memref<8x8x32xf32, #tpu.memory_space<vmem>>, vector<1x8x32xf32>
    %310 = vector.shape_cast %309 : vector<1x8x32xf32> to vector<8x32xf32>
    %311 = vector.shape_cast %308 : vector<8x32xf32> to vector<1x8x32xf32>
    tpu.vector_store %arg11[%c1_134, %c0_135, %c0_136], %311 {strides = array<i32>} : memref<8x8x32xf32, #tpu.memory_space<vmem>>, vector<1x8x32xf32>,
    %c7_137 = arith.constant 7 : index
    %c0_138 = arith.constant 0 : index
    %c0_139 = arith.constant 0 : index
    %312 = vector.load %arg9[%c7_137, %c0_138, %c0_139] : memref<8x8x256xf32, #tpu.memory_space<vmem>>, vector<1x8x256xf32>
    %313 = vector.shape_cast %312 : vector<1x8x256xf32> to vector<8x256xf32>
    %c0_140 = arith.constant 0 : index
    %c0_141 = arith.constant 0 : index
    %c0_142 = arith.constant 0 : index
    %314 = vector.load %arg9[%c0_140, %c0_141, %c0_142] : memref<8x8x256xf32, #tpu.memory_space<vmem>>, vector<1x8x256xf32>
    %315 = vector.shape_cast %314 : vector<1x8x256xf32> to vector<8x256xf32>
    %316 = arith.select %86, %313, %315 : vector<8x256xi1>, vector<8x256xf32>
    %cst_143 = arith.constant dense<0.000000e+00> : vector<8x256xf32>
    %317 = tpu.matmul %303, %92, %cst_143 {dimension_numbers = #tpu.dot_dimension_numbers<[1], [0], [0], [1], [0, 0, 1, 1], [], []>} : vector<8x64xf32>, vector<64x256xf32>, vector<8x256xf32> -> vector<8x256xf32>
    %318 = arith.addf %316, %317 : vector<8x256xf32>
    %319 = math.tanh %318 : vector<8x256xf32>
    %320 = arith.negf %318 : vector<8x256xf32>
    %321 = math.exp %320 : vector<8x256xf32>
    %cst_144 = arith.constant 1.000000e+00 : f32
    %322 = vector.broadcast %cst_144 : f32 to vector<8x256xf32>
    %323 = arith.addf %322, %321 : vector<8x256xf32>
    %324 = arith.divf %322, %323 : vector<8x256xf32>
    %325 = arith.select %91, %319, %324 : vector<8x256xi1>, vector<8x256xf32>
    %326 = vector.extract_strided_slice %325 {offsets = [0, 0], sizes = [8, 64], strides = [1, 1]} : vector<8x256xf32> to vector<8x64xf32>
    %327 = vector.extract_strided_slice %325 {offsets = [0, 64], sizes = [8, 64], strides = [1, 1]} : vector<8x256xf32> to vector<8x64xf32>
    %328 = vector.extract_strided_slice %325 {offsets = [0, 128], sizes = [8, 64], strides = [1, 1]} : vector<8x256xf32> to vector<8x64xf32>
    %329 = vector.extract_strided_slice %325 {offsets = [0, 192], sizes = [8, 64], strides = [1, 1]} : vector<8x256xf32> to vector<8x64xf32>
    %330 = arith.mulf %327, %301 : vector<8x64xf32>
    %331 = arith.mulf %326, %328 : vector<8x64xf32>
    %332 = arith.addf %330, %331 : vector<8x64xf32>
    %333 = math.tanh %332 : vector<8x64xf32>
    %334 = arith.mulf %329, %333 : vector<8x64xf32>
    %335 = vector.extract_strided_slice %334 {offsets = [0, 0], sizes = [8, 32], strides = [1, 1]} : vector<8x64xf32> to vector<8x32xf32>
    %c7_145 = arith.constant 7 : index
    %c0_146 = arith.constant 0 : index
    %c0_147 = arith.constant 0 : index
    %336 = vector.load %arg10[%c7_145, %c0_146, %c0_147] : memref<8x8x32xf32, #tpu.memory_space<vmem>>, vector<1x8x32xf32>
    %337 = vector.shape_cast %336 : vector<1x8x32xf32> to vector<8x32xf32>
    %338 = vector.shape_cast %335 : vector<8x32xf32> to vector<1x8x32xf32>
    tpu.vector_store %arg10[%c7_145, %c0_146, %c0_147], %338 {strides = array<i32>} : memref<8x8x32xf32, #tpu.memory_space<vmem>>, vector<1x8x32xf32>,
    %339 = vector.extract_strided_slice %334 {offsets = [0, 32], sizes = [8, 32], strides = [1, 1]} : vector<8x64xf32> to vector<8x32xf32>
    %c0_148 = arith.constant 0 : index
    %c0_149 = arith.constant 0 : index
    %c0_150 = arith.constant 0 : index
    %340 = vector.load %arg11[%c0_148, %c0_149, %c0_150] : memref<8x8x32xf32, #tpu.memory_space<vmem>>, vector<1x8x32xf32>
    %341 = vector.shape_cast %340 : vector<1x8x32xf32> to vector<8x32xf32>
    %342 = vector.shape_cast %339 : vector<8x32xf32> to vector<1x8x32xf32>
    tpu.vector_store %arg11[%c0_148, %c0_149, %c0_150], %342 {strides = array<i32>} : memref<8x8x32xf32, #tpu.memory_space<vmem>>, vector<1x8x32xf32>,
    %c0_151 = arith.constant 0 : index
    %c0_152 = arith.constant 0 : index
    %c0_153 = arith.constant 0 : index
    %343 = vector.load %arg10[%c0_151, %c0_152, %c0_153] : memref<8x8x32xf32, #tpu.memory_space<vmem>>, vector<8x8x32xf32>
    %c0_154 = arith.constant 0 : index
    %c0_155 = arith.constant 0 : index
    %c0_156 = arith.constant 0 : index
    %344 = vector.load %arg11[%c0_154, %c0_155, %c0_156] : memref<8x8x32xf32, #tpu.memory_space<vmem>>, vector<8x8x32xf32>
    %345 = tpu.concatenate %343, %344 in 2 : vector<8x8x32xf32>, vector<8x8x32xf32> -> vector<8x8x64xf32>
    %346 = vector.shape_cast %345 : vector<8x8x64xf32> to vector<64x64xf32>
    %c0_157 = arith.constant 0 : index
    %c0_158 = arith.constant 0 : index
    %347 = vector.load %arg6[%c0_157, %c0_158] : memref<64x128xf32, #tpu.memory_space<vmem>>, vector<64x128xf32>
    %cst_159 = arith.constant dense<0.000000e+00> : vector<64x128xf32>
    %348 = tpu.matmul %346, %347, %cst_159 {dimension_numbers = #tpu.dot_dimension_numbers<[1], [0], [0], [1], [0, 0, 1, 1], [], []>} : vector<64x64xf32>, vector<64x128xf32>, vector<64x128xf32> -> vector<64x128xf32>
    %c0_160 = arith.constant 0 : index
    %c0_161 = arith.constant 0 : index
    %349 = vector.load %arg7[%c0_160, %c0_161] : memref<1x128xf32, #tpu.memory_space<vmem>>, vector<1x128xf32>
    %350 = vector.broadcast %349 : vector<1x128xf32> to vector<64x128xf32>
    %351 = arith.addf %348, %350 : vector<64x128xf32>
    %352 = vector.shape_cast %351 : vector<64x128xf32> to vector<8x8x128xf32>
    %c0_162 = arith.constant 0 : index
    %c0_163 = arith.constant 0 : index
    %c0_164 = arith.constant 0 : index
    %353 = vector.load %arg8[%c0_162, %c0_163, %c0_164] : memref<8x8x128xf32, #tpu.memory_space<vmem>>, vector<8x8x128xf32>
    tpu.vector_store %arg8[%c0_162, %c0_163, %c0_164], %352 {strides = array<i32>} : memref<8x8x128xf32, #tpu.memory_space<vmem>>, vector<8x8x128xf32>,
    return
  }
  func.func @transform_0(%arg0: i32) -> (i32, i32, i32) {
    %c0_i32 = arith.constant 0 : i32
    %c0_i32_0 = arith.constant 0 : i32
    %c0_i32_1 = arith.constant 0 : i32
    return %arg0, %c0_i32, %c0_i32_0 : i32, i32, i32
  }
  func.func @transform_1(%arg0: i32) -> (i32, i32, i32) {
    %c0_i32 = arith.constant 0 : i32
    %c0_i32_0 = arith.constant 0 : i32
    %c0_i32_1 = arith.constant 0 : i32
    return %arg0, %c0_i32, %c0_i32_0 : i32, i32, i32
  }
  func.func @transform_2(%arg0: i32) -> (i32, i32) {
    %c0_i32 = arith.constant 0 : i32
    %c0_i32_0 = arith.constant 0 : i32
    %c0_i32_1 = arith.constant 0 : i32
    return %c0_i32, %c0_i32_0 : i32, i32
  }
  func.func @transform_3(%arg0: i32) -> (i32, i32) {
    %c0_i32 = arith.constant 0 : i32
    %c0_i32_0 = arith.constant 0 : i32
    %c0_i32_1 = arith.constant 0 : i32
    return %c0_i32, %c0_i32_0 : i32, i32
  }
  func.func @transform_4(%arg0: i32) -> (i32, i32) {
    %c0_i32 = arith.constant 0 : i32
    %c0_i32_0 = arith.constant 0 : i32
    %c0_i32_1 = arith.constant 0 : i32
    return %c0_i32, %c0_i32_0 : i32, i32
  }
  func.func @transform_5(%arg0: i32) -> (i32, i32) {
    %c0_i32 = arith.constant 0 : i32
    %c0_i32_0 = arith.constant 0 : i32
    %c0_i32_1 = arith.constant 0 : i32
    return %c0_i32, %c0_i32_0 : i32, i32
  }
  func.func @transform_6(%arg0: i32) -> (i32, i32) {
    %c0_i32 = arith.constant 0 : i32
    %c0_i32_0 = arith.constant 0 : i32
    %c0_i32_1 = arith.constant 0 : i32
    return %c0_i32, %c0_i32_0 : i32, i32
  }
  func.func @transform_7(%arg0: i32) -> (i32, i32, i32) {
    %c0_i32 = arith.constant 0 : i32
    %c0_i32_0 = arith.constant 0 : i32
    %c0_i32_1 = arith.constant 0 : i32
    return %c0_i32, %arg0, %c0_i32_0 : i32, i32, i32
  }
}

</mosaic_0001>

<bundles_post_ra>
// kernel: tpu_custom_call.1
= control target key start
LH: loop header
LB: loop body
LE: loop exit
PB: predicated region body
PF: predicated region fallthrough
CT: control target
= control target key end

     0   :  { %12 = vsyncpa [#allocation6], 0  ;;  %s4128_s0 = inlined_call_operand.hbm [shape: f32[8,16,64], index: 0, kind: input, shape index: {}]   ;;  %s4129_s1 = inlined_call_operand.hbm [shape: f32[8,16,16], index: 1, kind: input, shape index: {}]   ;;  %s4130_s2 = inlined_call_operand.hbm [shape: f32[128,256], index: 2, kind: input, shape index: {}]   ;;  %s4131_s3 = inlined_call_operand.hbm [shape: f32[64,256], index: 3, kind: input, shape index: {}]   ;;  %s4132_s4 = inlined_call_operand.vmem [shape: f32[1,256], index: 4, kind: input, shape index: {}]   ;;  %s4133_s5 = inlined_call_operand.hbm [shape: f32[64,128], index: 5, kind: input, shape index: {}]   ;;  %s4134_s6 = inlined_call_operand.vmem [shape: f32[1,128], index: 6, kind: input, shape index: {}]   ;;  %s4135_s7 = inlined_call_operand.hbm [shape: f32[8,8,128], index: 7, kind: output, shape index: {}]  }
   0x1   :  { %13 = vsyncpa [#allocation9], 0 }
   0x2   :  { %14 = vsyncpa [#allocation12], 0 }
   0x3   :  { %15 = vsyncpa [#allocation7], 0  ;;  %s3091_s24 = smov [#allocation8]  }
   0x4   :  { %s33_s25 = sshll.u32 %s3091_s24, 4  ;;  %s34_s25 = int_to_ptr.vmem [resolvable:$true] %s33_s25 }
   0x5   :  { %s2971_s26 = scalar_lea.vmem %s34_s25, 2048  ;;  %p2976_p1 = scmp.lt.s32.totalorder %s34_s25, %s34_s25 }
   0x6   :  { %p2972_p0 = scmp.ne.s32.totalorder %s34_s25, %s2971_s26  ;;  %p2977_p2 = scmp.lt.s32.totalorder %s2971_s26, %s2971_s26 }
   0x8   :  { %p2978_p3 = por %p2977_p2, %p2976_p1 }
   0xa   :  { %p2979_p4 = pnand %p2978_p3, %p2972_p0 }
   0xc   :  { %2982 = shalt.err (!%p2979_p4)
}
   0xd   :  { %s3092_s27 = smov 128   ;;  %s3093_s28 = smov 8  }
   0xe   :  { %39 = dma.hbm_to_vmem [thread:$0]  %s4129_s1, 2048, %s34_s25, [#allocation9], %s3092_s27, %s3092_s27, %s3093_s28  }
   0xf   :  { %s3094_s8 = smov [#allocation11]   ;;  %s3095_s10 = smov [#allocation5]  }
  0x10   :  { %s57_s9 = sshll.u32 %s3094_s8, 4  ;;  %s21_s11 = sshll.u32 %s3095_s10, 4  ;;  %s58_s9 = int_to_ptr.vmem [resolvable:$true] %s57_s9  ;;  %s22_s11 = int_to_ptr.vmem [resolvable:$true] %s21_s11 }
  0x11   :  { %s2991_s12 = scalar_lea.vmem %s58_s9, 2048  ;;  %p2996_p6 = scmp.lt.s32.totalorder %s58_s9, %s58_s9 }
  0x12   :  { %p2992_p5 = scmp.ne.s32.totalorder %s58_s9, %s2991_s12  ;;  %p2997_p7 = scmp.lt.s32.totalorder %s2991_s12, %s2991_s12 }
  0x14   :  { %p2998_p8 = por %p2997_p7, %p2996_p6 }
  0x16   :  { %p2999_p9 = pnand %p2998_p8, %p2992_p5 }
  0x18   :  { %3002 = shalt.err (!%p2999_p9)
}
  0x19   :  { %s3096_s13 = smov 256   ;;  %s3097_s14 = smov 16  }
  0x1a   :  { %63 = dma.hbm_to_vmem [thread:$0]  %s4131_s3, 2048, %s58_s9, [#allocation12], %s3096_s13, %s3096_s13, %s3097_s14  }
  0x1b   :  { %s3011_s1 = scalar_lea.vmem %s22_s11, 2048  ;;  %p3016_p11 = scmp.lt.s32.totalorder %s22_s11, %s22_s11 }
  0x1c   :  { %p3012_p10 = scmp.ne.s32.totalorder %s22_s11, %s3011_s1  ;;  %p3017_p12 = scmp.lt.s32.totalorder %s3011_s1, %s3011_s1 }
  0x1e   :  { %p3018_p13 = por %p3017_p12, %p3016_p11 }
  0x20   :  { %p3019_p0 = pnand %p3018_p13, %p3012_p10 }
  0x22   :  { %3022 = shalt.err (!%p3019_p0)
}
  0x23   :  { %27 = dma.hbm_to_vmem [thread:$0]  %s4128_s0, 2048, %s22_s11, [#allocation6], %s3092_s27, %s3092_s27, %s3093_s28  }
  0x24   :  { %s3098_s19 = smov [#allocation10]   ;;  %s3099_s21 = smov [#allocation13]  }
  0x25   :  { %s45_s20 = sshll.u32 %s3098_s19, 4  ;;  %s71_s3 = sshll.u32 %s3099_s21, 4  ;;  %s46_s20 = int_to_ptr.vmem [resolvable:$true] %s45_s20  ;;  %s72_s3 = int_to_ptr.vmem [resolvable:$true] %s71_s3 }
  0x26   :  { %s3031_s22 = scalar_lea.vmem %s46_s20, 4096  ;;  %p3036_p2 = scmp.lt.s32.totalorder %s46_s20, %s46_s20 }
  0x27   :  { %p3032_p1 = scmp.ne.s32.totalorder %s46_s20, %s3031_s22  ;;  %p3037_p3 = scmp.lt.s32.totalorder %s3031_s22, %s3031_s22 }
  0x29   :  { %p3038_p4 = por %p3037_p3, %p3036_p2 }
  0x2b   :  { %p3039_p5 = pnand %p3038_p4, %p3032_p1 }
  0x2d   :  { %3042 = shalt.err (!%p3039_p5)
}
  0x2e   :  { %51 = dma.hbm_to_vmem [thread:$0]  %s4130_s2, 4096, %s46_s20, [#allocation9], %s3096_s13, %s3096_s13, %s3097_s14  }
  0x2f   :  { %s3051_s25 = scalar_lea.vmem %s72_s3, 1024  ;;  %p3056_p7 = scmp.lt.s32.totalorder %s72_s3, %s72_s3 }
  0x30   :  { %p3052_p6 = scmp.ne.s32.totalorder %s72_s3, %s3051_s25  ;;  %p3057_p8 = scmp.lt.s32.totalorder %s3051_s25, %s3051_s25 }
  0x32   :  { %p3058_p9 = por %p3057_p8, %p3056_p7 }
  0x34   :  { %p3059_p10 = pnand %p3058_p9, %p3052_p6 }
  0x36   :  { %3062 = shalt.err (!%p3059_p10)
}
  0x37   :  { %77 = dma.hbm_to_vmem [thread:$0]  %s4133_s5, 1024, %s72_s3, [#allocation12], %s3092_s27, %s3092_s27, %s3093_s28  }
  0x38   :  { %3083 = dma.done.wait [#allocation6], 2048  }
  0x39   :  { %3084 = vsyncadd [#allocation6], 4294965248 }
  0x3a   :  { %3085 = dma.done.wait [#allocation9], 6144  }
  0x3b   :  { %3086 = vsyncadd [#allocation9], 4294961152 }
  0x3c   :  { %3087 = dma.done.wait [#allocation12], 3072  }
  0x3d   :  { %3088 = vsyncadd [#allocation12], 4294964224  ;;  %vm127_vm0 = vcmask 130048   ;;  %v96_v0 = vld [vmem:[#allocation5 + $0x8] sm:$0xff]  ;;  %v95_v1 = vld [vmem:[#allocation5] sm:$0xff]  ;;  %s3101_s2 = smov 64  }
  0x3e   :  { %v3168_v2 = vld [vmem:[#allocation8] sm:$0xff]  ;;  %2722 = vmatprep.subr.mxu0 %v96_v0  ;;  %v112_v3 = vld [vmem:[#allocation8 + $0x8] sm:$0xff]  ;;  %v98_v4 = vld [vmem:[#allocation5 + $0x18] sm:$0xff]  ;;  %vm920_vm15 = vcmask 523264   ;;  %s3103_s9 = smov [#allocation14]  }
  0x3f   :  { %2726 = vmatprep.mubr.msk.f32.mxu0 %vm127_vm0, %v3168_v2  ;;  %2723 = vmatpush3.msra.mxu0 %v96_v0  ;;  %v779_v5 = vsel %vm127_vm0, %v112_v3, 0.0  ;;  %v3173_v6 = vld [vmem:[#allocation8 + $0x10] sm:$0xff]  ;;  %v102_v7 = vld [vmem:[#allocation5 + $0x38] sm:$0xff]  ;;  %v100_v11 = vld [vmem:[#allocation5 + $0x28] sm:$0xff]  ;;  %v776_v40 = vsel %vm127_vm0, %v3168_v2, 0.0 }
  0x40   :  { %2724 = vmatprep.subr.mxu0 %v95_v1  ;;  %780 = vadd.xlane.f32.xlu0 %v779_v5  ;;  %v97_v8 = vld [vmem:[#allocation5 + $0x10] sm:$0xff]  ;;  %v114_v10 = vld [vmem:[#allocation8 + $0x18] sm:$0xff]  ;;  %v3178_v12 = vld [vmem:[#allocation8 + $0x20] sm:$0xff]  ;;  %v782_v41 = vsel %vm127_vm0, %v3173_v6, 0.0 }
  0x41   :  { %2725 = vmatpush3.msra.mxu0 %v95_v1  ;;  %2743 = vmatprep.subr.mxu1 %v102_v7  ;;  %v101_v9 = vld [vmem:[#allocation5 + $0x30] sm:$0xff]  ;;  %v99_v13 = vld [vmem:[#allocation5 + $0x20] sm:$0xff]  ;;  %v116_v15 = vld [vmem:[#allocation8 + $0x28] sm:$0xff]  ;;  %v785_v33 = vsel %vm127_vm0, %v114_v10, 0.0  ;;  %v788_v42 = vsel %vm127_vm0, %v3178_v12, 0.0 }
  0x42   :  { %2727 = vmatmul.mubr.msk.f32.vlgmr.msra.gmra.mxu0 %vm127_vm0, %v112_v3  ;;  %2729 = vmatprep.subr.mxu0 %v98_v4  ;;  %v3181_v14 = vld [vmem:[#allocation8 + $0x30] sm:$0xff]  ;;  %v104_v16 = vld [vmem:[#allocation5 + $0x48] sm:$0xff]  ;;  %v118_v17 = vld [vmem:[#allocation8 + $0x38] sm:$0xff]  ;;  %v791_v31 = vsel %vm127_vm0, %v116_v15, 0.0 }
  0x43   :  { %2730 = vmatpush3.msra.mxu0 %v98_v4  ;;  %2733 = vmatprep.mubr.msk.f32.mxu0 %vm127_vm0, %v3173_v6  ;;  %v103_v18 = vld [vmem:[#allocation5 + $0x40] sm:$0xff]  ;;  %v106_v20 = vld [vmem:[#allocation5 + $0x58] sm:$0xff]  ;;  %v120_v21 = vld [vmem:[#allocation8 + $0x48] sm:$0xff]  ;;  %v797_v35 = vsel %vm127_vm0, %v118_v17, 0.0  ;;  %v794_v43 = vsel %vm127_vm0, %v3181_v14, 0.0 }
  0x44   :  { %2731 = vmatprep.subr.mxu0 %v97_v8  ;;  %2744 = vmatpush3.msra.mxu1 %v102_v7  ;;  %v119_v19 = vld [vmem:[#allocation8 + $0x40] sm:$0xff]  ;;  %v108_v22 = vld [vmem:[#allocation5 + $0x68] sm:$0xff]  ;;  %v105_v23 = vld [vmem:[#allocation5 + $0x50] sm:$0xff]  ;;  %v803_v36 = vsel %vm127_vm0, %v120_v21, 0.0 }
  0x45   :  { %2732 = vmatpush3.msra.mxu0 %v97_v8  ;;  %2745 = vmatprep.subr.mxu1 %v101_v9  ;;  %v107_v24 = vld [vmem:[#allocation5 + $0x60] sm:$0xff]  ;;  %v121_v25 = vld [vmem:[#allocation8 + $0x50] sm:$0xff]  ;;  %v122_v27 = vld [vmem:[#allocation8 + $0x58] sm:$0xff]  ;;  %v800_v44 = vsel %vm127_vm0, %v119_v19, 0.0 }
  0x46   :  { %2734 = vmatmul.mubr.msk.f32.vlgmr.msra.gmra.mxu0 %vm127_vm0, %v114_v10  ;;  %2736 = vmatprep.subr.mxu0 %v100_v11  ;;  %v123_v26 = vld [vmem:[#allocation8 + $0x60] sm:$0xff]  ;;  %v124_v28 = vld [vmem:[#allocation8 + $0x68] sm:$0xff]  ;;  %v110_v29 = vld [vmem:[#allocation5 + $0x78] sm:$0xff]  ;;  %v809_v37 = vsel %vm127_vm0, %v122_v27, 0.0  ;;  %v806_v45 = vsel %vm127_vm0, %v121_v25, 0.0 }
  0x47   :  { %2737 = vmatpush3.msra.mxu0 %v100_v11  ;;  %2740 = vmatprep.mubr.msk.f32.mxu0 %vm127_vm0, %v3178_v12  ;;  %v125_v30 = vld [vmem:[#allocation8 + $0x70] sm:$0xff]  ;;  %v126_v34 = vld [vmem:[#allocation8 + $0x78] sm:$0xff]  ;;  %v815_v38 = vsel %vm127_vm0, %v124_v28, 0.0  ;;  %v812_v46 = vsel %vm127_vm0, %v123_v26, 0.0  ;;  %v982_v50 = vld [vmem:[#allocation10 + $0xe8] sm:$0xff] }
  0x48   :  { %2738 = vmatprep.subr.mxu0 %v99_v13  ;;  %2746 = vmatpush3.msra.mxu1 %v101_v9  ;;  %v109_v32 = vld [vmem:[#allocation5 + $0x70] sm:$0xff]  ;;  %v821_v39 = vsel %vm127_vm0, %v126_v34, 0.0  ;;  %v818_v47 = vsel %vm127_vm0, %v125_v30, 0.0  ;;  %v984_v48 = vld [vmem:[#allocation10 + $0xf8] sm:$0xff]  ;;  %v981_v51 = vld [vmem:[#allocation10 + $0xe0] sm:$0xff] }
  0x49   :  { %2739 = vmatpush3.msra.mxu0 %v99_v13  ;;  %2747 = vmatprep.mubr.msk.f32.mxu1 %vm127_vm0, %v3181_v14  ;;  %v983_v49 = vld [vmem:[#allocation10 + $0xf0] sm:$0xff]  ;;  %v980_v52 = vld [vmem:[#allocation10 + $0xd8] sm:$0xff]  ;;  %v978_v54 = vld [vmem:[#allocation10 + $0xc8] sm:$0xff] }
  0x4a   :  { %2741 = vmatmul.mubr.msk.f32.vlgmr.msra.gmra.mxu0 %vm127_vm0, %v116_v15  ;;  %2750 = vmatprep.subr.mxu0 %v104_v16  ;;  %v979_v53 = vld [vmem:[#allocation10 + $0xd0] sm:$0xff]  ;;  %v977_v55 = vld [vmem:[#allocation10 + $0xc0] sm:$0xff]  ;;  %v976_v56 = vld [vmem:[#allocation10 + $0xb8] sm:$0xff] }
  0x4b   :  { %2751 = vmatpush3.msra.mxu0 %v104_v16  ;;  %2748 = vmatmul.mubr.msk.f32.vlgmr.msra.gmra.mxu1 %vm127_vm0, %v118_v17  ;;  %v975_v57 = vld [vmem:[#allocation10 + $0xb0] sm:$0xff]  ;;  %v974_v58 = vld [vmem:[#allocation10 + $0xa8] sm:$0xff]  ;;  %v973_v59 = vld [vmem:[#allocation10 + $0xa0] sm:$0xff] }
  0x4c   :  { %2752 = vmatprep.subr.mxu0 %v103_v18  ;;  %2754 = vmatprep.mubr.msk.f32.mxu0 %vm127_vm0, %v119_v19  ;;  %v972_v60 = vld [vmem:[#allocation10 + $0x98] sm:$0xff]  ;;  %v971_v61 = vld [vmem:[#allocation10 + $0x90] sm:$0xff]  ;;  %v970_v62 = vld [vmem:[#allocation10 + $0x88] sm:$0xff] }
  0x4d   :  { %2753 = vmatpush3.msra.mxu0 %v103_v18  ;;  %2757 = vmatprep.subr.mxu1 %v106_v20  ;;  %v969_v63 = vld [vmem:[#allocation10 + $0x80] sm:$0xff]  ;;  %v968_v0 = vld [vmem:[#allocation10 + $0x78] sm:$0xff]  ;;  %v967_v1 = vld [vmem:[#allocation10 + $0x70] sm:$0xff] }
  0x4e   :  { %2755 = vmatmul.mubr.msk.f32.vlgmr.msra.gmra.mxu0 %vm127_vm0, %v120_v21  ;;  %2764 = vmatprep.subr.mxu0 %v108_v22  ;;  %v966_v2 = vld [vmem:[#allocation10 + $0x68] sm:$0xff]  ;;  %v965_v3 = vld [vmem:[#allocation10 + $0x60] sm:$0xff]  ;;  %v964_v4 = vld [vmem:[#allocation10 + $0x58] sm:$0xff] }
  0x4f   :  { %2758 = vmatpush3.msra.mxu1 %v106_v20  ;;  %2765 = vmatpush3.msra.mxu0 %v108_v22  ;;  %v963_v5 = vld [vmem:[#allocation10 + $0x50] sm:$0xff]  ;;  %v962_v6 = vld [vmem:[#allocation10 + $0x48] sm:$0xff]  ;;  %v961_v7 = vld [vmem:[#allocation10 + $0x40] sm:$0xff] }
  0x50   :  { %2759 = vmatprep.subr.mxu1 %v105_v23  ;;  %2766 = vmatprep.subr.mxu0 %v107_v24  ;;  %v960_v8 = vld [vmem:[#allocation10 + $0x38] sm:$0xff]  ;;  %v959_v9 = vld [vmem:[#allocation10 + $0x30] sm:$0xff]  ;;  %v958_v10 = vld [vmem:[#allocation10 + $0x28] sm:$0xff] }
  0x51   :  { %2760 = vmatpush3.msra.mxu1 %v105_v23  ;;  %2761 = vmatprep.mubr.msk.f32.mxu1 %vm127_vm0, %v121_v25  ;;  %v957_v11 = vld [vmem:[#allocation10 + $0x20] sm:$0xff]  ;;  %v956_v12 = vld [vmem:[#allocation10 + $0x18] sm:$0xff]  ;;  %v955_v13 = vld [vmem:[#allocation10 + $0x10] sm:$0xff] }
  0x52   :  { %2767 = vmatpush3.msra.mxu0 %v107_v24  ;;  %2768 = vmatprep.mubr.msk.f32.mxu0 %vm127_vm0, %v123_v26  ;;  %v954_v14 = vld [vmem:[#allocation10 + $0x8] sm:$0xff]  ;;  %v953_v23 = vld [vmem:[#allocation10] sm:$0xff]  ;;  %v4136_v24 = vmov 0.0  }
  0x53   :  { %2762 = vmatmul.mubr.msk.f32.vlgmr.msra.gmra.mxu1 %vm127_vm0, %v122_v27  ;;  %2769 = vmatmul.mubr.msk.f32.vlgmr.msra.gmra.mxu0 %vm127_vm0, %v124_v28 }
  0x54   :  { %2771 = vmatprep.subr.mxu1 %v110_v29  ;;  %2775 = vmatprep.mubr.msk.f32.mxu1 %vm127_vm0, %v125_v30 }
  0x55   :  { %2772 = vmatpush3.msra.mxu1 %v110_v29  ;;  %792 = vadd.xlane.f32.xlu1 %v791_v31 }
  0x56   :  { %2773 = vmatprep.subr.mxu1 %v109_v32  ;;  %786 = vadd.xlane.f32.xlu0 %v785_v33 }
  0x57   :  { %2774 = vmatpush3.msra.mxu1 %v109_v32  ;;  %997 = vmatprep.subr.mxu0 %v984_v48 }
  0x58   :  { %2776 = vmatmul.mubr.msk.f32.vlgmr.msra.gmra.mxu1 %vm127_vm0, %v126_v34  ;;  %998 = vmatpush1.msra.mxu0 %v983_v49 }
  0x59   :  { %798 = vadd.xlane.f32.xlu1 %v797_v35  ;;  %999 = vmatprep.subr.mxu0 %v982_v50  ;;  %v3233_v50 = vld [vmem:[#allocation11 + $0x68] sm:$0xff] }
  0x5a   :  { %804 = vadd.xlane.f32.xlu0 %v803_v36  ;;  %1000 = vmatpush1.msra.mxu0 %v981_v51 }
  0x5b   :  { %1001 = vmatprep.subr.mxu0 %v980_v52  ;;  %1061 = vmatprep.mubr.f32.mxu0 %v4136_v24  ;;  %v3237_v52 = vld [vmem:[#allocation11 + $0x60] sm:$0xff] }
  0x5c   :  { %1002 = vmatpush1.msra.mxu0 %v979_v53  ;;  %1520 = vmatprep.mubr.f32.mxu1 %v4136_v24 }
  0x5d   :  { %810 = vadd.xlane.f32.xlu1 %v809_v37  ;;  %1003 = vmatprep.subr.mxu0 %v978_v54  ;;  %v3240_v54 = vld [vmem:[#allocation11 + $0x58] sm:$0xff] }
  0x5e   :  { %816 = vadd.xlane.f32.xlu0 %v815_v38  ;;  %1004 = vmatpush1.msra.mxu0 %v977_v55  ;;  %v3242_v55 = vld [vmem:[#allocation11 + $0x50] sm:$0xff] }
  0x5f   :  { %1005 = vmatprep.subr.mxu0 %v976_v56 }
  0x60   :  { %1006 = vmatpush1.msra.mxu0 %v975_v57  ;;  %v3245_v57 = vld [vmem:[#allocation11 + $0x48] sm:$0xff] }
  0x61   :  { %822 = vadd.xlane.f32.xlu1 %v821_v39  ;;  %1007 = vmatprep.subr.mxu0 %v974_v58 }
  0x62   :  { %777 = vadd.xlane.f32.xlu0 %v776_v40  ;;  %1008 = vmatpush1.msra.mxu0 %v973_v59 }
  0x63   :  { %1009 = vmatprep.subr.mxu0 %v972_v60 }
  0x64   :  { %1010 = vmatpush1.msra.mxu0 %v971_v61 }
  0x65   :  { %783 = vadd.xlane.f32.xlu1 %v782_v41  ;;  %1011 = vmatprep.subr.mxu0 %v970_v62  ;;  %v3254_v62 = vld [vmem:[#allocation11 + $0x40] sm:$0xff] }
  0x66   :  { %789 = vadd.xlane.f32.xlu0 %v788_v42  ;;  %1012 = vmatpush1.msra.mxu0 %v969_v63  ;;  %v3224_v42 = vld [vmem:[#allocation11 + $0x78] sm:$0xff] }
  0x67   :  { %1013 = vmatprep.subr.mxu0 %v968_v0  ;;  %1472 = vmatprep.subr.mxu1 %v3224_v42  ;;  %v3256_v63 = vld [vmem:[#allocation11 + $0x38] sm:$0xff]  ;;  %v3259_v0 = vld [vmem:[#allocation11 + $0x30] sm:$0xff] }
  0x68   :  { %1014 = vmatpush1.msra.mxu0 %v967_v1 }
  0x69   :  { %795 = vadd.xlane.f32.xlu1 %v794_v43  ;;  %1015 = vmatprep.subr.mxu0 %v966_v2  ;;  %v3226_v43 = vld [vmem:[#allocation11 + $0x70] sm:$0xff] }
  0x6a   :  { %801 = vadd.xlane.f32.xlu0 %v800_v44  ;;  %1016 = vmatpush1.msra.mxu0 %v965_v3 }
  0x6b   :  { %1017 = vmatprep.subr.mxu0 %v964_v4  ;;  %1473 = vmatpush1.msra.mxu1 %v3226_v43 }
  0x6c   :  { %1018 = vmatpush1.msra.mxu0 %v963_v5  ;;  %1474 = vmatprep.subr.mxu1 %v3233_v50  ;;  %v3263_v5 = vld [vmem:[#allocation11 + $0x28] sm:$0xff] }
  0x6d   :  { %807 = vadd.xlane.f32.xlu1 %v806_v45  ;;  %1019 = vmatprep.subr.mxu0 %v962_v6 }
  0x6e   :  { %813 = vadd.xlane.f32.xlu0 %v812_v46  ;;  %1020 = vmatpush1.msra.mxu0 %v961_v7  ;;  %v3268_v7 = vld [vmem:[#allocation11 + $0x20] sm:$0xff] }
  0x6f   :  { %1021 = vmatprep.subr.mxu0 %v960_v8  ;;  %1475 = vmatpush1.msra.mxu1 %v3237_v52 }
  0x70   :  { %1022 = vmatpush1.msra.mxu0 %v959_v9  ;;  %1476 = vmatprep.subr.mxu1 %v3240_v54  ;;  %v3272_v9 = vld [vmem:[#allocation11 + $0x18] sm:$0xff] }
  0x71   :  { %819 = vadd.xlane.f32.xlu1 %v818_v47  ;;  %1023 = vmatprep.subr.mxu0 %v958_v10  ;;  %v3275_v10 = vld [vmem:[#allocation11 + $0x10] sm:$0xff] }
  0x72   :  { %1024 = vmatpush1.msra.mxu0 %v957_v11  ;;  %1477 = vmatpush1.msra.mxu1 %v3242_v55 }
  0x73   :  { %1025 = vmatprep.subr.mxu0 %v956_v12  ;;  %1478 = vmatprep.subr.mxu1 %v3245_v57  ;;  %v3278_v12 = vld [vmem:[#allocation11 + $0x8] sm:$0xff] }
  0x74   :  { %1026 = vmatpush1.msra.mxu0 %v955_v13  ;;  %1479 = vmatpush1.msra.mxu1 %v3254_v62 }
  0x75   :  { %1027 = vmatprep.subr.mxu0 %v954_v14  ;;  %1480 = vmatprep.subr.mxu1 %v3256_v63  ;;  %v3281_v14 = vld [vmem:[#allocation11] sm:$0xff] }
  0x76   :  { %1028 = vmatpush1.msra.mxu0 %v953_v23  ;;  %1481 = vmatpush1.msra.mxu1 %v3259_v0  ;;  %4139 = vst [vmem:[#allocation19_spill] sm:$0xff] %v3281_v14 }
  0x77   :  { %1823 = vmatprep.subr.mxu0 %v3224_v42  ;;  %1482 = vmatprep.subr.mxu1 %v3263_v5 }
  0x78   :  { %1483 = vmatpush1.msra.mxu1 %v3268_v7 }
  0x79   :  { %1484 = vmatprep.subr.mxu1 %v3272_v9 }
  0x7a   :  { %1485 = vmatpush1.msra.mxu1 %v3275_v10 }
  0x7b   :  { %1486 = vmatprep.subr.mxu1 %v3278_v12 }
  0x7c   :  { %1487 = vmatpush1.msra.mxu1 %v3281_v14 }
  0x7d   :  { %1521 = vmatmul.mubr.f32.vlgmr.msra.gmra.mxu1 %v4136_v24  ;;  %1589 = vmatprep.subr.mxu1 %v3224_v42 }
  0x7e   :  { %1590 = vmatpush1.msra.mxu1 %v3226_v43  ;;  %1637 = vmatprep.mubr.f32.mxu1 %v4136_v24 }
  0x7f   :  { %1591 = vmatprep.subr.mxu1 %v3233_v50 }
  0x80   :  { %1592 = vmatpush1.msra.mxu1 %v3237_v52 }
  0x81   :  { %1593 = vmatprep.subr.mxu1 %v3240_v54 }
  0x82   :  { %1594 = vmatpush1.msra.mxu1 %v3242_v55 }
  0x83   :  { %1595 = vmatprep.subr.mxu1 %v3245_v57 }
  0x84   :  { %1596 = vmatpush1.msra.mxu1 %v3254_v62 }
  0x85   :  { %1597 = vmatprep.subr.mxu1 %v3256_v63 }
  0x86   :  { %1598 = vmatpush1.msra.mxu1 %v3259_v0 }
  0x87   :  { %1599 = vmatprep.subr.mxu1 %v3263_v5 }
  0x88   :  { %1600 = vmatpush1.msra.mxu1 %v3268_v7 }
  0x89   :  { %1601 = vmatprep.subr.mxu1 %v3272_v9 }
  0x8a   :  { %1602 = vmatpush1.msra.mxu1 %v3275_v10 }
  0x8b   :  { %1603 = vmatprep.subr.mxu1 %v3278_v12 }
  0x8c   :  { %1604 = vmatpush1.msra.mxu1 %v3281_v14 }
  0x8d   :  { %1706 = vmatprep.subr.mxu1 %v3224_v42 }
  0xc9   :  { %v781_v15 = vpop.xlane.xlu0 %780 }
  0xca   :  { %vm825_vm1 = vcmp.eq.f32.partialorder %v781_v15, 0.0 }
  0xcb   :  { %v841_v16 = vsel %vm825_vm1, 1.0, %v781_v15 }
  0xcc   :  { %2819 = vrcp.f32 %v841_v16 }
  0xd9   :  { %v2820_v29 = vpop.eup %2819 }
  0xde   :  { %v793_v17 = vpop.xlane.xlu1 %792 }
  0xdf   :  { %v787_v18 = vpop.xlane.xlu0 %786  ;;  %vm829_vm3 = vcmp.eq.f32.partialorder %v793_v17, 0.0 }
  0xe0   :  { %vm827_vm2 = vcmp.eq.f32.partialorder %v787_v18, 0.0  ;;  %v845_v22 = vsel %vm829_vm3, 1.0, %v793_v17 }
  0xe1   :  { %v843_v19 = vsel %vm827_vm2, 1.0, %v787_v18 }
  0xe2   :  { %v799_v20 = vpop.xlane.xlu1 %798  ;;  %2821 = vrcp.f32 %v843_v19 }
  0xe3   :  { %vm831_vm4 = vcmp.eq.f32.partialorder %v799_v20, 0.0  ;;  %v805_v21 = vpop.xlane.xlu0 %804  ;;  %2823 = vrcp.f32 %v845_v22 }
  0xe4   :  { %vm833_vm5 = vcmp.eq.f32.partialorder %v805_v21, 0.0  ;;  %v847_v25 = vsel %vm831_vm4, 1.0, %v799_v20 }
  0xe5   :  { %v849_v26 = vsel %vm833_vm5, 1.0, %v805_v21  ;;  %2825 = vrcp.f32 %v847_v25 }
  0xe6   :  { %v811_v27 = vpop.xlane.xlu1 %810  ;;  %2827 = vrcp.f32 %v849_v26 }
  0xe7   :  { %vm835_vm6 = vcmp.eq.f32.partialorder %v811_v27, 0.0  ;;  %v817_v28 = vpop.xlane.xlu0 %816 }
  0xe8   :  { %vm837_vm7 = vcmp.eq.f32.partialorder %v817_v28, 0.0  ;;  %v851_v30 = vsel %vm835_vm6, 1.0, %v811_v27 }
  0xe9   :  { %v853_v31 = vsel %vm837_vm7, 1.0, %v817_v28  ;;  %2829 = vrcp.f32 %v851_v30 }
  0xea   :  { %v823_v32 = vpop.xlane.xlu1 %822  ;;  %2831 = vrcp.f32 %v853_v31 }
  0xeb   :  { %vm839_vm8 = vcmp.eq.f32.partialorder %v823_v32, 0.0  ;;  %v778_v15 = vpop.xlane.xlu0 %777 }
  0xec   :  { %v855_v37 = vsel %vm839_vm8, 1.0, %v823_v32  ;;  %vm824_vm9 = vcmp.eq.f32.partialorder %v778_v15, 0.0 }
  0xed   :  { %2833 = vrcp.f32 %v855_v37  ;;  %v840_v17 = vsel %vm824_vm9, 1.0, %v778_v15  ;;  %vm2626_vm0 = vmneg %vm824_vm9 }
  0xee   :  { %v784_v16 = vpop.xlane.xlu1 %783  ;;  %2835 = vrcp.f32 %v840_v17  ;;  %v987_v17 = vlaneseq }
  0xef   :  { %v2822_v35 = vpop.eup %2821  ;;  %vm826_vm10 = vcmp.eq.f32.partialorder %v784_v16, 0.0  ;;  %v790_v18 = vpop.xlane.xlu0 %789 }
  0xf0   :  { %v2824_v40 = vpop.eup %2823  ;;  %v842_v19 = vsel %vm826_vm10, 1.0, %v784_v16  ;;  %vm828_vm11 = vcmp.eq.f32.partialorder %v790_v18, 0.0  ;;  %vm2628_vm2 = vmneg %vm826_vm10  ;;  %vm1127_vm10 = vcmask 1041409  }
  0xf1   :  { %2837 = vrcp.f32 %v842_v19  ;;  %v844_v21 = vsel %vm828_vm11, 1.0, %v790_v18  ;;  %vm2630_vm4 = vmneg %vm828_vm11  ;;  %v988_v18 = vshrl.u32 %v987_v17, 7  ;;  %vm1130_vm11 = vcmask 1042434  }
  0xf2   :  { %v2826_v44 = vpop.eup %2825  ;;  %v796_v20 = vpop.xlane.xlu1 %795  ;;  %2839 = vrcp.f32 %v844_v21  ;;  %v3387_v21 = vand.u32 127, %v987_v17 }
  0xf3   :  { %v2828_v48 = vpop.eup %2827  ;;  %vm830_vm12 = vcmp.eq.f32.partialorder %v796_v20, 0.0  ;;  %v3309_v22 = vpop.xlane.xlu0 %801  ;;  %v989_v19 = vsub.s32 0, %v988_v18 }
  0xf4   :  { %v846_v23 = vsel %vm830_vm12, 1.0, %v796_v20  ;;  %vm832_vm13 = vcmp.eq.f32.partialorder %v3309_v22, 0.0  ;;  %vm2632_vm5 = vmneg %vm830_vm12  ;;  %v985_v20 = vld [vmem:[%s4132_s4] sm:$0x3]  ;;  %vm1133_vm12 = vcmask 1043459   ;;  %s3102_s4 = smov 32  }
  0xf5   :  { %2841 = vrcp.f32 %v846_v23  ;;  %v848_v27 = vsel %vm832_vm13, 1.0, %v3309_v22  ;;  %vm2634_vm6 = vmneg %vm832_vm13  ;;  %v993_v22 = vsub.s32 1, %v988_v18  ;;  %v3389_v23 = vrot.slane %v985_v20, %v989_v19 }
  0xf6   :  { %v2830_v58 = vpop.eup %2829  ;;  %v3313_v25 = vpop.xlane.xlu1 %807  ;;  %2843 = vrcp.f32 %v848_v27  ;;  %vm1136_vm13 = vcmask 1044484  }
  0xf7   :  { %v2832_v60 = vpop.eup %2831  ;;  %v3318_v28 = vpop.xlane.xlu0 %813  ;;  %vm834_vm14 = vcmp.eq.f32.partialorder %v3313_v25, 0.0 }
  0xf8   :  { %v850_v31 = vsel %vm834_vm14, 1.0, %v3313_v25  ;;  %vm836_vm1 = vcmp.eq.f32.partialorder %v3318_v28, 0.0  ;;  %vm2636_vm7 = vmneg %vm834_vm14  ;;  %v3392_v25 = vadd.s32 128, %v3387_v21  ;;  %vm1139_vm14 = vcmask 1045509  }
  0xf9   :  { %2845 = vrcp.f32 %v850_v31  ;;  %v852_v37 = vsel %vm836_vm1, 1.0, %v3318_v28  ;;  %vm2638_vm8 = vmneg %vm836_vm1  ;;  %vm1145_vm1 = vcmask 1047559  }
  0xfa   :  { %v2834_v8 = vpop.eup %2833  ;;  %v3325_v32 = vpop.xlane.xlu1 %819  ;;  %2847 = vrcp.f32 %v852_v37  ;;  %v1410_v31 = vand.u32 63, %v3392_v25 }
  0xfb   :  { %v2836_v26 = vpop.eup %2835  ;;  %vm838_vm3 = vcmp.eq.f32.partialorder %v3325_v32, 0.0 }
  0xfc   :  { %vm2640_vm9 = vmneg %vm838_vm3 }
  0xfe   :  { %v2838_v30 = vpop.eup %2837 }
 0x102   :  { %v2728_v33 = vpop.f32.mrf.mxu0 }
 0x103   :  { %v859_v34 = vmul.f32 %v2820_v29, %v2728_v33 }
 0x104   :  { %v3218_v36 = vpop.f32.mrf.mxu0 }
 0x105   :  { %896 = vrot.lane.b32.xlu0 %v859_v34, %s3101_s2  ;;  %v857_v29 = vmul.f32 %v2836_v26, %v3218_v36  ;;  %v2840_v36 = vpop.eup %2839  ;;  %v3394_v26 = vrot.slane %v985_v20, %v993_v22 }
 0x106   :  { %v2735_v38 = vpop.f32.mrf.mxu0 }
 0x107   :  { %v863_v39 = vmul.f32 %v2822_v35, %v2735_v38 }
 0x108   :  { %v3221_v41 = vpop.f32.mrf.mxu0 }
 0x109   :  { %898 = vrot.lane.b32.xlu1 %v863_v39, %s3101_s2  ;;  %v861_v35 = vmul.f32 %v2838_v30, %v3221_v41  ;;  %v2842_v41 = vpop.eup %2841  ;;  %v1403_v30 = vand.u32 63, %v3387_v21 }
 0x10a   :  { %v2742_v45 = vpop.f32.mrf.mxu0 }
 0x10b   :  { %v867_v46 = vmul.f32 %v2824_v40, %v2742_v45  ;;  %v2749_v47 = vpop.f32.mrf.mxu1 }
 0x10c   :  { %v3231_v49 = vpop.f32.mrf.mxu0  ;;  %v871_v51 = vmul.f32 %v2826_v44, %v2749_v47  ;;  %v854_v44 = vsel %vm838_vm3, 1.0, %v3325_v32  ;;  %vm3531_vm3 = vcmp.lt.s32.totalorder %v1410_v31, 32 }
 0x10d   :  { %900 = vrot.lane.b32.xlu1 %v867_v46, %s3101_s2  ;;  %v3250_v61 = vpop.f32.mrf.mxu1  ;;  %v865_v40 = vmul.f32 %v2840_v36, %v3231_v49  ;;  %2849 = vrcp.f32 %v854_v44 }
 0x10e   :  { %v2756_v53 = vpop.f32.mrf.mxu0  ;;  %v869_v47 = vmul.f32 %v2842_v41, %v3250_v61 }
 0x10f   :  { %v875_v56 = vmul.f32 %v2828_v48, %v2756_v53  ;;  %v2844_v48 = vpop.eup %2843 }
 0x110   :  { %v3247_v59 = vpop.f32.mrf.mxu0 }
 0x111   :  { %902 = vrot.lane.b32.xlu1 %v871_v51, %s3101_s2  ;;  %904 = vrot.lane.b32.xlu0 %v875_v56, %s3101_s2  ;;  %v873_v56 = vmul.f32 %v2844_v48, %v3247_v59 }
 0x113   :  { %v2763_v1 = vpop.f32.mrf.mxu1  ;;  %v2770_v2 = vpop.f32.mrf.mxu0 }
 0x114   :  { %v879_v3 = vmul.f32 %v2830_v58, %v2763_v1  ;;  %v883_v4 = vmul.f32 %v2832_v60, %v2770_v2  ;;  %v2846_v58 = vpop.eup %2845 }
 0x115   :  { %v3265_v6 = vpop.f32.mrf.mxu1  ;;  %v2848_v1 = vpop.eup %2847 }
 0x116   :  { %906 = vrot.lane.b32.xlu1 %v879_v3, %s3101_s2  ;;  %908 = vrot.lane.b32.xlu0 %v883_v4, %s3101_s2  ;;  %v877_v59 = vmul.f32 %v2846_v58, %v3265_v6  ;;  %v686_v2 = vpop.f32.mrf.mxu0 }
 0x118   :  { %v2777_v11 = vpop.f32.mrf.mxu1 }
 0x119   :  { %v887_v13 = vmul.f32 %v2834_v8, %v2777_v11  ;;  %v881_v8 = vmul.f32 %v2848_v1, %v686_v2 }
 0x11a   :  { %v2850_v11 = vpop.eup %2849 }
 0x11b   :  { %910 = vrot.lane.b32.xlu1 %v887_v13, %s3101_s2  ;;  %v767_v13 = vpop.f32.mrf.mxu1 }
 0x11c   :  { %v885_v15 = vmul.f32 %v2850_v11, %v767_v13 }
 0x177   :  { %v897_v33 = vpop.permute.xlu0 %896 }
 0x178   :  { %v921_v34 = vsel %vm920_vm15, %v857_v29, %v897_v33 }
 0x179   :  { %2627 = vmatmul.mubr.msk.f32.vlgmr.msra.gmra.mxu0 %vm2626_vm0, %v921_v34  ;;  %vm1142_vm0 = vcmask 1046534  }
 0x17a   :  { %1067 = vmatprep.mubr.f32.mxu0 %v4136_v24  ;;  %1824 = vmatpush1.msra.mxu0 %v3226_v43 }
 0x17b   :  { %v899_v38 = vpop.permute.xlu1 %898  ;;  %1825 = vmatprep.subr.mxu0 %v3233_v50 }
 0x17c   :  { %v922_v39 = vsel %vm920_vm15, %v861_v35, %v899_v38  ;;  %1826 = vmatpush1.msra.mxu0 %v3237_v52 }
 0x17d   :  { %2629 = vmatmul.mubr.msk.f32.gmra.mxu0 %vm2628_vm2, %v922_v39  ;;  %1827 = vmatprep.subr.mxu0 %v3240_v54  ;;  %vm3514_vm2 = vcmp.lt.s32.totalorder %v1403_v30, 32 }
 0x17e   :  { %1073 = vmatprep.mubr.f32.mxu0 %v4136_v24  ;;  %1828 = vmatpush1.msra.mxu0 %v3242_v55 }
 0x17f   :  { %v901_v45 = vpop.permute.xlu1 %900  ;;  %1829 = vmatprep.subr.mxu0 %v3245_v57 }
 0x180   :  { %v923_v46 = vsel %vm920_vm15, %v865_v40, %v901_v45  ;;  %1830 = vmatpush1.msra.mxu0 %v3254_v62 }
 0x181   :  { %2631 = vmatmul.mubr.msk.f32.gmra.mxu0 %vm2630_vm4, %v923_v46  ;;  %1831 = vmatprep.subr.mxu0 %v3256_v63  ;;  %vm1428_vm4 = vcmp.lt.s32.totalorder %v3392_v25, 192 }
 0x182   :  { %1079 = vmatprep.mubr.f32.mxu0 %v4136_v24  ;;  %1832 = vmatpush1.msra.mxu0 %v3259_v0 }
 0x183   :  { %v903_v49 = vpop.permute.xlu1 %902  ;;  %1833 = vmatprep.subr.mxu0 %v3263_v5  ;;  %v905_v53 = vpop.permute.xlu0 %904 }
 0x184   :  { %v924_v51 = vsel %vm920_vm15, %v869_v47, %v903_v49  ;;  %1834 = vmatpush1.msra.mxu0 %v3268_v7  ;;  %v925_v60 = vsel %vm920_vm15, %v873_v56, %v905_v53 }
 0x185   :  { %2633 = vmatmul.mubr.msk.f32.gmra.mxu0 %vm2632_vm5, %v924_v51  ;;  %1835 = vmatprep.subr.mxu0 %v3272_v9  ;;  %vm1558_vm5 = vcmask 261120  }
 0x186   :  { %1085 = vmatprep.mubr.f32.mxu0 %v4136_v24  ;;  %1836 = vmatpush1.msra.mxu0 %v3275_v10 }
 0x187   :  { %1837 = vmatprep.subr.mxu0 %v3278_v12 }
 0x188   :  { %1838 = vmatpush1.msra.mxu0 %v3281_v14  ;;  %v907_v61 = vpop.permute.xlu1 %906  ;;  %v909_v4 = vpop.permute.xlu0 %908 }
 0x189   :  { %2635 = vmatmul.mubr.msk.f32.gmra.mxu0 %vm2634_vm6, %v925_v60  ;;  %2057 = vmatprep.subr.mxu0 %v3224_v42  ;;  %v926_v3 = vsel %vm920_vm15, %v877_v59, %v907_v61  ;;  %v927_v42 = vsel %vm920_vm15, %v881_v8, %v909_v4 }
 0x18a   :  { %1091 = vmatprep.mubr.f32.mxu0 %v4136_v24 }
 0x18d   :  { %2637 = vmatmul.mubr.msk.f32.gmra.mxu0 %vm2636_vm7, %v926_v3  ;;  %v911_v6 = vpop.permute.xlu1 %910 }
 0x18e   :  { %1097 = vmatprep.mubr.f32.mxu0 %v4136_v24  ;;  %v928_v16 = vsel %vm920_vm15, %v885_v15, %v911_v6 }
 0x191   :  { %2639 = vmatmul.mubr.msk.f32.gmra.mxu0 %vm2638_vm8, %v927_v42 }
 0x192   :  { %1103 = vmatprep.mubr.f32.mxu0 %v4136_v24 }
 0x195   :  { %2641 = vmatmul.mubr.msk.f32.gmra.mxu0 %vm2640_vm9, %v928_v16 }
 0x196   :  { %1871 = vmatprep.mubr.f32.mxu0 %v4136_v24 }
 0x239   :  { %v1063_v27 = vpop.f32.mrf.mxu0 }
 0x23a   :  { %v3397_v28 = vadd.f32 %v1063_v27, %v3389_v23 }
 0x23b   :  { %v1065_v29 = vpop.f32.mrf.mxu0 }
 0x23c   :  { %v3402_v32 = vadd.f32 %v1065_v29, %v3394_v26  ;;  %v1363_v33 = vrot.slane %v3397_v28, 7  ;;  %v1165_v34 = vrot.slane %v3397_v28, 1  ;;  %v1330_v35 = vrot.slane %v3397_v28, 6 }
 0x23d   :  { %v1069_v36 = vpop.f32.mrf.mxu0  ;;  %v1198_v37 = vrot.slane %v3397_v28, 2  ;;  %v1297_v38 = vrot.slane %v3397_v28, 5  ;;  %v1231_v39 = vrot.slane %v3397_v28, 3 }
 0x23e   :  { %v3412_v41 = vadd.f32 %v1069_v36, %v3389_v23  ;;  %v1377_v44 = vrot.slane %v3402_v32, 7  ;;  %v1179_v45 = vrot.slane %v3402_v32, 1  ;;  %v1344_v46 = vrot.slane %v3402_v32, 6 }
 0x23f   :  { %v1071_v47 = vpop.f32.mrf.mxu0  ;;  %v1212_v48 = vrot.slane %v3402_v32, 2  ;;  %v1311_v49 = vrot.slane %v3402_v32, 5 }
 0x240   :  { %v3422_v56 = vadd.f32 %v1071_v47, %v3394_v26  ;;  %v1126_v58 = vrot.slane %v3412_v41, 7  ;;  %v1364_v60 = vrot.slane %v3412_v41, 6  ;;  %v1166_v61 = vsel %vm1127_vm10, %v3412_v41, %v1165_v34 }
 0x241   :  { %v1075_v59 = vpop.f32.mrf.mxu0  ;;  %v1331_v1 = vrot.slane %v3412_v41, 5  ;;  %v1199_v2 = vrot.slane %v3412_v41, 1  ;;  %v1298_v3 = vrot.slane %v3412_v41, 4 }
 0x242   :  { %v3433_v8 = vadd.f32 %v1075_v59, %v3389_v23  ;;  %v1128_v11 = vsel %vm1127_vm10, %v1126_v58, %v3397_v28  ;;  %v1365_v13 = vsel %vm1127_vm10, %v1364_v60, %v1363_v33  ;;  %v1147_v42 = vrot.slane %v3422_v56, 7 }
 0x243   :  { %v1077_v6 = vpop.f32.mrf.mxu0  ;;  %v1378_v15 = vrot.slane %v3422_v56, 6  ;;  %v1332_v16 = vsel %vm1127_vm10, %v1331_v1, %v1330_v35  ;;  %v1180_v17 = vsel %vm1127_vm10, %v3422_v56, %v1179_v45  ;;  %v1345_v18 = vrot.slane %v3422_v56, 5 }
 0x244   :  { %v3445_v19 = vadd.f32 %v1077_v6, %v3394_v26  ;;  %v1129_v20 = vrot.slane %v3433_v8, 6  ;;  %v1366_v22 = vrot.slane %v3433_v8, 5  ;;  %v1148_v27 = vsel %vm1127_vm10, %v1147_v42, %v3402_v32 }
 0x245   :  { %v1081_v29 = vpop.f32.mrf.mxu0  ;;  %v1379_v33 = vsel %vm1127_vm10, %v1378_v15, %v1377_v44  ;;  %v1167_v34 = vrot.slane %v3433_v8, 7  ;;  %v1333_v35 = vrot.slane %v3433_v8, 4  ;;  %v3455_v36 = vsel %vm1127_vm10, %v1345_v18, %v1344_v46 }
 0x246   :  { %v3458_v45 = vadd.f32 %v1081_v29, %v3389_v23  ;;  %v1131_v47 = vsel %vm1130_vm11, %v1129_v20, %v1128_v11  ;;  %v1367_v58 = vsel %vm1130_vm11, %v1366_v22, %v1365_v13  ;;  %v1149_v60 = vrot.slane %v3445_v19, 6 }
 0x247   :  { %v1083_v59 = vpop.f32.mrf.mxu0  ;;  %v1380_v1 = vrot.slane %v3445_v19, 5  ;;  %v1168_v44 = vsel %vm1130_vm11, %v1167_v34, %v1166_v61  ;;  %v1334_v42 = vsel %vm1130_vm11, %v1333_v35, %v1332_v16  ;;  %v1181_v6 = vrot.slane %v3445_v19, 7 }
 0x248   :  { %v3468_v46 = vadd.f32 %v1083_v59, %v3394_v26  ;;  %v1132_v15 = vrot.slane %v3458_v45, 5  ;;  %v1368_v11 = vrot.slane %v3458_v45, 4  ;;  %v1150_v13 = vsel %vm1130_vm11, %v1149_v60, %v1148_v27 }
 0x249   :  { %v1087_v18 = vpop.f32.mrf.mxu0  ;;  %v1381_v20 = vsel %vm1130_vm11, %v1380_v1, %v1379_v33  ;;  %v1169_v22 = vrot.slane %v3458_v45, 6  ;;  %v1335_v61 = vrot.slane %v3458_v45, 3  ;;  %v1182_v16 = vsel %vm1130_vm11, %v1181_v6, %v1180_v17 }
 0x24a   :  { %v3478_v29 = vadd.f32 %v1087_v18, %v3389_v23  ;;  %v1134_v34 = vsel %vm1133_vm12, %v1132_v15, %v1131_v47  ;;  %v1369_v35 = vsel %vm1133_vm12, %v1368_v11, %v1367_v58  ;;  %v1151_v27 = vrot.slane %v3468_v46, 5 }
 0x24b   :  { %v1089_v60 = vpop.f32.mrf.mxu0  ;;  %v1382_v59 = vrot.slane %v3468_v46, 4  ;;  %v1170_v33 = vsel %vm1133_vm12, %v1169_v22, %v1168_v44  ;;  %v1336_v1 = vsel %vm1133_vm12, %v1335_v61, %v1334_v42  ;;  %v1183_v24 = vrot.slane %v3468_v46, 6 }
 0x24c   :  { %v3488_v17 = vadd.f32 %v1089_v60, %v3394_v26  ;;  %v1135_v6 = vrot.slane %v3478_v29, 4  ;;  %v1370_v47 = vrot.slane %v3478_v29, 3  ;;  %v1152_v58 = vsel %vm1133_vm12, %v1151_v27, %v1150_v13 }
 0x24d   :  { %v1093_v15 = vpop.f32.mrf.mxu0  ;;  %v1383_v11 = vsel %vm1133_vm12, %v1382_v59, %v1381_v20  ;;  %v1171_v18 = vrot.slane %v3478_v29, 5  ;;  %v1337_v44 = vrot.slane %v3478_v29, 2  ;;  %v1184_v42 = vsel %vm1133_vm12, %v1183_v24, %v1182_v16 }
 0x24e   :  { %v3498_v22 = vadd.f32 %v1093_v15, %v3389_v23  ;;  %v1137_v61 = vsel %vm1136_vm13, %v1135_v6, %v1134_v34  ;;  %v1371_v60 = vsel %vm1136_vm13, %v1370_v47, %v1369_v35  ;;  %v1153_v53 = vrot.slane %v3488_v17, 4 }
 0x24f   :  { %v1095_v13 = vpop.f32.mrf.mxu0  ;;  %v1384_v27 = vrot.slane %v3488_v17, 3  ;;  %v1172_v20 = vsel %vm1136_vm13, %v1171_v18, %v1170_v33  ;;  %v1338_v59 = vsel %vm1136_vm13, %v1337_v44, %v1336_v1  ;;  %v1185_v51 = vrot.slane %v3488_v17, 5 }
 0x250   :  { %v3508_v24 = vadd.f32 %v1095_v13, %v3394_v26  ;;  %v1138_v16 = vrot.slane %v3498_v22, 3  ;;  %v1372_v34 = vrot.slane %v3498_v22, 2  ;;  %v1154_v6 = vsel %vm1136_vm13, %v1153_v53, %v1152_v58 }
 0x251   :  { %v1099_v33 = vpop.f32.mrf.mxu0  ;;  %v1385_v1 = vsel %vm1136_vm13, %v1384_v27, %v1383_v11  ;;  %v1173_v47 = vrot.slane %v3498_v22, 4  ;;  %v1339_v15 = vrot.slane %v3498_v22, 1  ;;  %v1186_v18 = vsel %vm1136_vm13, %v1185_v51, %v1184_v42 }
 0x252   :  { %v3524_v44 = vadd.f32 %v1099_v33, %v3389_v23  ;;  %v1140_v21 = vsel %vm1139_vm14, %v1138_v16, %v1137_v61  ;;  %v1373_v30 = vsel %vm1139_vm14, %v1372_v34, %v1371_v60  ;;  %v1155_v13 = vrot.slane %v3508_v24, 3 }
 0x253   :  { %v1101_v58 = vpop.f32.mrf.mxu0  ;;  %v1386_v11 = vrot.slane %v3508_v24, 2  ;;  %v1174_v51 = vsel %vm1139_vm14, %v1173_v47, %v1172_v20  ;;  %v1340_v42 = vsel %vm1139_vm14, %v1339_v15, %v1338_v59  ;;  %v1187_v27 = vrot.slane %v3508_v24, 4 }
 0x254   :  { %v3540_v61 = vadd.f32 %v1101_v58, %v3394_v26  ;;  %v1141_v60 = vrot.slane %v3524_v44, 2  ;;  %v1374_v16 = vrot.slane %v3524_v44, 1  ;;  %v1156_v31 = vsel %vm1139_vm14, %v1155_v13, %v1154_v6 }
 0x255   :  { %v1105_v34 = vpop.f32.mrf.mxu0  ;;  %v1387_v33 = vsel %vm1139_vm14, %v1386_v11, %v1385_v1  ;;  %v1175_v40 = vrot.slane %v3524_v44, 3  ;;  %v1341_v20 = vsel %vm1142_vm0, %v3524_v44, %v1340_v42  ;;  %v1188_v59 = vsel %vm1139_vm14, %v1187_v27, %v1186_v18  ;;  %v1522_v27 = vpop.f32.mrf.mxu1 }
 0x256   :  { %v3551_v47 = vadd.f32 %v1105_v34, %v3389_v23  ;;  %v1143_v15 = vsel %vm1142_vm0, %v1141_v60, %v1140_v21  ;;  %v1375_v58 = vsel %vm1142_vm0, %v1374_v16, %v1373_v30  ;;  %v1157_v4 = vrot.slane %v3540_v61, 2 }
 0x257   :  { %v1107_v6 = vpop.f32.mrf.mxu0  ;;  %v1388_v13 = vrot.slane %v3540_v61, 1  ;;  %v1176_v1 = vsel %vm1142_vm0, %v1175_v40, %v1174_v51  ;;  %v1189_v11 = vrot.slane %v3540_v61, 3  ;;  %v1347_v42 = vrot.slane %v3445_v19, 4 }
 0x258   :  { %v3561_v18 = vadd.f32 %v1107_v6, %v3394_v26  ;;  %v1144_v23 = vrot.slane %v3551_v47, 1  ;;  %v3566_v21 = vsel %vm1145_vm1, %v3551_v47, %v1375_v58  ;;  %v1158_v30 = vsel %vm1142_vm0, %v1157_v4, %v1156_v31 }
 0x259   :  { %v1389_v60 = vsel %vm1142_vm0, %v1388_v13, %v1387_v33  ;;  %v1177_v40 = vrot.slane %v3551_v47, 2  ;;  %v1342_v51 = vrot.slane %v3551_v47, 7  ;;  %v1190_v16 = vsel %vm1142_vm0, %v1189_v11, %v1188_v59 }
 0x25a   :  { %v3574_v26 = vsel %vm1145_vm1, %v1144_v23, %v1143_v15  ;;  %v1159_v34 = vrot.slane %v3561_v18, 1  ;;  %v3579_v58 = vsel %vm1145_vm1, %v3561_v18, %v1389_v60  ;;  %v1191_v4 = vrot.slane %v3561_v18, 2 }
 0x25b   :  { %v1451_v31 = vsel %vm3514_vm2, %v3574_v26, %v3566_v21  ;;  %v3587_v33 = vsel %vm1145_vm1, %v1177_v40, %v1176_v1  ;;  %v3590_v59 = vsel %vm1145_vm1, %v1342_v51, %v1341_v20  ;;  %v1348_v15 = vsel %vm1130_vm11, %v1347_v42, %v3455_v36  ;;  %v1524_v1 = vpop.f32.mrf.mxu1 }
 0x25c   :  { %v1527_v6 = vadd.f32 %v1522_v27, %v1451_v31  ;;  %v3595_v13 = vsel %vm1145_vm1, %v1159_v34, %v1158_v30  ;;  %v3602_v23 = vsel %vm1145_vm1, %v1191_v4, %v1190_v16  ;;  %v1349_v36 = vrot.slane %v3468_v46, 3 }
 0x25d   :  { %v1452_v20 = vsel %vm3531_vm3, %v3595_v13, %v3579_v58  ;;  %v1351_v42 = vrot.slane %v3488_v17, 2  ;;  %v1353_v30 = vrot.slane %v3508_v24, 1  ;;  %v1356_v40 = vrot.slane %v3561_v18, 7 }
 0x25e   :  { %v2642_v27 = vmul.f32 -1.442695, %v1527_v6  ;;  %v1528_v60 = vadd.f32 %v1524_v1, %v1452_v20  ;;  %v1200_v51 = vsel %vm1127_vm10, %v1199_v2, %v1198_v37  ;;  %v1350_v16 = vsel %vm1133_vm12, %v1349_v36, %v1348_v15 }
 0x25f   :  { %v1201_v34 = vsel %vm1130_vm11, %v3433_v8, %v1200_v51  ;;  %v1202_v4 = vrot.slane %v3458_v45, 7  ;;  %v1204_v31 = vrot.slane %v3478_v29, 6  ;;  %v1352_v20 = vsel %vm1136_vm13, %v1351_v42, %v1350_v16 }
 0x260   :  { %2851 = vpow2.f32 %v2642_v27  ;;  %v2643_v6 = vmul.f32 -1.442695, %v1528_v60  ;;  %v1206_v1 = vrot.slane %v3498_v22, 5  ;;  %v1354_v11 = vsel %vm1139_vm14, %v1353_v30, %v1352_v20 }
 0x261   :  { %2853 = vtanh.f32 %v1528_v60  ;;  %v1203_v37 = vsel %vm1133_vm12, %v1202_v4, %v1201_v34  ;;  %v1208_v2 = vrot.slane %v3524_v44, 4  ;;  %v1355_v15 = vsel %vm1142_vm0, %v3540_v61, %v1354_v11 }
 0x262   :  { %2855 = vpow2.f32 %v2643_v6  ;;  %v1205_v36 = vsel %vm1136_vm13, %v1204_v31, %v1203_v37  ;;  %v1210_v27 = vrot.slane %v3551_v47, 3  ;;  %v3632_v51 = vsel %vm1145_vm1, %v1356_v40, %v1355_v15 }
 0x263   :  { %v1207_v42 = vsel %vm1139_vm14, %v1206_v1, %v1205_v36  ;;  %v1299_v30 = vsel %vm1127_vm10, %v1298_v3, %v1297_v38  ;;  %v1300_v60 = vrot.slane %v3433_v8, 3  ;;  %v1302_v40 = vrot.slane %v3458_v45, 2 }
 0x264   :  { %v1209_v16 = vsel %vm1142_vm0, %v1208_v2, %v1207_v42  ;;  %v1304_v34 = vrot.slane %v3478_v29, 1  ;;  %v1307_v38 = vrot.slane %v3524_v44, 7  ;;  %v1309_v3 = vrot.slane %v3551_v47, 6 }
 0x265   :  { %v3649_v4 = vsel %vm1145_vm1, %v1210_v27, %v1209_v16  ;;  %v1301_v31 = vsel %vm1130_vm11, %v1300_v60, %v1299_v30  ;;  %v1213_v20 = vrot.slane %v3422_v56, 1  ;;  %v1216_v1 = vrot.slane %v3468_v46, 7 }
 0x266   :  { %v1303_v6 = vsel %vm1133_vm12, %v1302_v40, %v1301_v31  ;;  %v1218_v37 = vrot.slane %v3488_v17, 6  ;;  %v1220_v15 = vrot.slane %v3508_v24, 5  ;;  %v1222_v36 = vrot.slane %v3540_v61, 4 }
 0x267   :  { %v1305_v2 = vsel %vm1136_vm13, %v1304_v34, %v1303_v6  ;;  %v1224_v27 = vrot.slane %v3561_v18, 3  ;;  %v1214_v30 = vsel %vm1127_vm10, %v1213_v20, %v1212_v48  ;;  %v1312_v60 = vrot.slane %v3422_v56, 4 }
 0x268   :  { %v1306_v42 = vsel %vm1139_vm14, %v3498_v22, %v1305_v2  ;;  %v1314_v16 = vrot.slane %v3445_v19, 3  ;;  %v1215_v34 = vsel %vm1130_vm11, %v3445_v19, %v1214_v30  ;;  %v1316_v31 = vrot.slane %v3468_v46, 2 }
 0x269   :  { %v1308_v40 = vsel %vm1142_vm0, %v1307_v38, %v1306_v42  ;;  %v1318_v6 = vrot.slane %v3488_v17, 1  ;;  %v1217_v2 = vsel %vm1133_vm12, %v1216_v1, %v1215_v34  ;;  %v1313_v48 = vsel %vm1127_vm10, %v1312_v60, %v1311_v49 }
 0x26a   :  { %v3675_v11 = vsel %vm1145_vm1, %v1309_v3, %v1308_v40  ;;  %v1321_v20 = vrot.slane %v3540_v61, 7  ;;  %v1219_v42 = vsel %vm1136_vm13, %v1218_v37, %v1217_v2  ;;  %v1315_v30 = vsel %vm1130_vm11, %v1314_v16, %v1313_v48 }
 0x26b   :  { %v1323_v3 = vrot.slane %v3561_v18, 6  ;;  %v1221_v40 = vsel %vm1139_vm14, %v1220_v15, %v1219_v42  ;;  %v1317_v1 = vsel %vm1133_vm12, %v1316_v31, %v1315_v30  ;;  %v4144_v49 = vrot.slane %v3412_v41, 2 }
 0x26c   :  { %v1234_v34 = vrot.slane %v3433_v8, 1  ;;  %v1223_v38 = vsel %vm1142_vm0, %v1222_v36, %v1221_v40  ;;  %v1319_v37 = vsel %vm1136_vm13, %v1318_v6, %v1317_v1  ;;  %v1237_v16 = vrot.slane %v3478_v29, 7 }
 0x26d   :  { %v1233_v60 = vsel %vm1127_vm10, %v4144_v49, %v1231_v39  ;;  %v2852_v14 = vpop.eup %2851  ;;  %v1239_v2 = vrot.slane %v3498_v22, 6  ;;  %v3704_v48 = vsel %vm1145_vm1, %v1224_v27, %v1223_v38  ;;  %v1320_v39 = vsel %vm1139_vm14, %v3508_v24, %v1319_v37 }
 0x26e   :  { %v3701_v15 = vpop.eup %2853  ;;  %v1537_v31 = vadd.f32 1.0, %v2852_v14  ;;  %v1235_v42 = vsel %vm1130_vm11, %v1234_v34, %v1233_v60  ;;  %v1322_v36 = vsel %vm1142_vm0, %v1321_v20, %v1320_v39  ;;  %v1241_v40 = vrot.slane %v3524_v44, 5 }
 0x26f   :  { %v2856_v30 = vpop.eup %2855  ;;  %v1236_v6 = vsel %vm1133_vm12, %v3458_v45, %v1235_v42  ;;  %v1243_v1 = vrot.slane %v3551_v47, 4  ;;  %v3715_v27 = vsel %vm1145_vm1, %v1323_v3, %v1322_v36  ;;  %v1265_v60 = vrot.slane %v3412_v41, 3 }
 0x270   :  { %2857 = vrcp.f32 %v1537_v31  ;;  %v1538_v14 = vadd.f32 1.0, %v2856_v30  ;;  %v1238_v38 = vsel %vm1136_vm13, %v1237_v16, %v1236_v6  ;;  %v1687_v49 = vsel %vm3531_vm3, %v3704_v48, %v3715_v27 }
 0x271   :  { %v1240_v20 = vsel %vm1139_vm14, %v1239_v2, %v1238_v38  ;;  %v1267_v34 = vrot.slane %v3433_v8, 2  ;;  %v1269_v31 = vrot.slane %v3458_v45, 1  ;;  %v1272_v3 = vrot.slane %v3498_v22, 7 }
 0x272   :  { %2859 = vrcp.f32 %v1538_v14  ;;  %v1242_v37 = vsel %vm1142_vm0, %v1241_v40, %v1240_v20  ;;  %v4145_v39 = vrot.slane %v3397_v28, 4  ;;  %v1274_v2 = vrot.slane %v3524_v44, 6 }
 0x273   :  { %v3729_v16 = vsel %vm1145_vm1, %v1243_v1, %v1242_v37  ;;  %v1276_v41 = vrot.slane %v3551_v47, 5  ;;  %v1246_v30 = vrot.slane %v3422_v56, 2  ;;  %v1248_v36 = vrot.slane %v3445_v19, 1 }
 0x274   :  { %v1266_v42 = vsel %vm1127_vm10, %v1265_v60, %v4145_v39  ;;  %v1251_v45 = vrot.slane %v3488_v17, 7  ;;  %v1253_v6 = vrot.slane %v3508_v24, 6  ;;  %v1255_v28 = vrot.slane %v3540_v61, 5 }
 0x275   :  { %v1268_v8 = vsel %vm1130_vm11, %v1267_v34, %v1266_v42  ;;  %v1257_v40 = vrot.slane %v3561_v18, 4  ;;  %v4146_v47 = vrot.slane %v3402_v32, 3  ;;  %v1279_v14 = vrot.slane %v3422_v56, 3 }
 0x276   :  { %v1270_v22 = vsel %vm1133_vm12, %v1269_v31, %v1268_v8  ;;  %v1281_v38 = vrot.slane %v3445_v19, 2  ;;  %v1283_v34 = vrot.slane %v3468_v46, 1  ;;  %v1286_v37 = vrot.slane %v3508_v24, 7 }
 0x277   :  { %v1271_v44 = vsel %vm1136_vm13, %v3478_v29, %v1270_v22  ;;  %v1247_v1 = vsel %vm1127_vm10, %v1246_v30, %v4146_v47  ;;  %v4147_v39 = vrot.slane %v3402_v32, 4  ;;  %v1288_v56 = vrot.slane %v3540_v61, 6 }
 0x278   :  { %v1273_v20 = vsel %vm1139_vm14, %v1272_v3, %v1271_v44  ;;  %v1249_v60 = vsel %vm1130_vm11, %v1248_v36, %v1247_v1  ;;  %v1290_v24 = vrot.slane %v3561_v18, 5  ;;  %v2037_v18 = vsel %vm3514_vm2, %v3675_v11, %v3649_v4 }
 0x279   :  { %v1275_v31 = vsel %vm1142_vm0, %v1274_v2, %v1273_v20  ;;  %v1250_v29 = vsel %vm1133_vm12, %v3468_v46, %v1249_v60  ;;  %v1280_v42 = vsel %vm1127_vm10, %v1279_v14, %v4147_v39  ;;  %v2038_v36 = vsel %vm3531_vm3, %v3715_v27, %v3704_v48 }
 0x27a   :  { %v3763_v19 = vsel %vm1145_vm1, %v1276_v41, %v1275_v31  ;;  %v1252_v3 = vsel %vm1136_vm13, %v1251_v45, %v1250_v29  ;;  %v1282_v8 = vsel %vm1130_vm11, %v1281_v38, %v1280_v42  ;;  %v2272_v47 = vsel %vm3531_vm3, %v3579_v58, %v3595_v13 }
 0x27b   :  { %v1803_v46 = vsel %vm3514_vm2, %v3729_v16, %v3763_v19  ;;  %v1254_v32 = vsel %vm1139_vm14, %v1253_v6, %v1252_v3  ;;  %v1284_v2 = vsel %vm1133_vm12, %v1283_v34, %v1282_v8  ;;  %v1920_v61 = vsel %vm3514_vm2, %v3763_v19, %v3729_v16 }
 0x27c   :  { %v1256_v41 = vsel %vm1142_vm0, %v1255_v28, %v1254_v32  ;;  %v1285_v30 = vsel %vm1136_vm13, %v3488_v17, %v1284_v2  ;;  %v2154_v17 = vsel %vm3514_vm2, %v3590_v59, %v3587_v33  ;;  %v2155_v6 = vsel %vm3531_vm3, %v3632_v51, %v3602_v23 }
 0x27d   :  { %v3790_v45 = vsel %vm1145_vm1, %v1257_v40, %v1256_v41  ;;  %v1287_v22 = vsel %vm1139_vm14, %v1286_v37, %v1285_v30  ;;  %v2858_v28 = vpop.eup %2857  ;;  %v2271_v40 = vsel %vm3514_vm2, %v3566_v21, %v3574_v26 }
 0x27e   :  { %v1289_v44 = vsel %vm1142_vm0, %v1288_v56, %v1287_v22  ;;  %v1545_v37 = vmul.f32 0.0, %v2858_v28 }
 0x27f   :  { %v3812_v1 = vsel %vm1145_vm1, %v1290_v24, %v1289_v44  ;;  %v2860_v14 = vpop.eup %2859 }
 0x280   :  { %v1804_v38 = vsel %vm3531_vm3, %v3790_v45, %v3812_v1  ;;  %v1921_v20 = vsel %vm3531_vm3, %v3812_v1, %v3790_v45  ;;  %v1544_v60 = vsel %vm1428_vm4, %v3701_v15, %v2860_v14  ;;  %v4148_v15 = vmov 0.0  }
 0x281   :  { %v1546_v34 = vmul.f32 %v2858_v28, %v1544_v60 }
 0x283   :  { %1548 = vrot.lane.b32.xlu0 %v1546_v34, %s3101_s2  ;;  %v3874_v34 = vld [vmem:[#allocation11 + $0x68] sm:$0xff] }
 0x2f5   :  { %v1549_v31 = vpop.permute.xlu0 %1548 }
 0x2f6   :  { %v1551_v29 = vadd.f32 %v1549_v31, %v1545_v37  ;;  %v3877_v37 = vld [vmem:[#allocation11 + $0x60] sm:$0xff]  ;;  %v3880_v31 = vld [vmem:[#allocation11 + $0x58] sm:$0xff] }
 0x2f8   :  { %2861 = vtanh.f32 %v1551_v29 }
 0x305   :  { %v2862_v39 = vpop.eup %2861 }
 0x306   :  { %v3826_v42 = vmul.f32 %v2862_v39, %v1544_v60  ;;  %v3870_v60 = vld [vmem:[#allocation11 + $0x70] sm:$0xff]  ;;  %v3886_v39 = vld [vmem:[#allocation11 + $0x48] sm:$0xff] }
 0x308   :  { %1555 = vrot.lane.b32.xlu1 %v3826_v42, %s3101_s2 }
 0x37a   :  { %v1556_v56 = vpop.permute.xlu1 %1555 }
 0x37b   :  { %1559 = vst.msk [vmem:[#allocation3] sm:$0xff] %vm1558_vm5, %v1556_v56  ;;  %2644 = vmatmul.mubr.msk.f32.vlgmr.msra.gmra.mxu1 %vm920_vm15, %v1556_v56  ;;  %v3889_v56 = vld [vmem:[#allocation11 + $0x40] sm:$0xff] }
 0x37c   :  { %1707 = vmatpush1.msra.mxu1 %v3226_v43  ;;  %1754 = vmatprep.mubr.f32.mxu1 %v4148_v15  ;;  %v4149_v43 = vld [vmem:[#allocation19_spill] sm:$0xff] }
 0x37d   :  { %1708 = vmatprep.subr.mxu1 %v3233_v50  ;;  %v3848_v50 = vld [vmem:[#allocation11 + $0x78] sm:$0xff] }
 0x37e   :  { %1709 = vmatpush1.msra.mxu1 %v3237_v52 }
 0x37f   :  { %1710 = vmatprep.subr.mxu1 %v3240_v54  ;;  %v4150_v54 = vsel %vm3514_vm2, %v3587_v33, %v3590_v59 }
 0x380   :  { %1711 = vmatpush1.msra.mxu1 %v3242_v55 }
 0x381   :  { %1712 = vmatprep.subr.mxu1 %v3245_v57 }
 0x382   :  { %1713 = vmatpush1.msra.mxu1 %v3254_v62 }
 0x383   :  { %1714 = vmatprep.subr.mxu1 %v3256_v63  ;;  %v4151_v63 = vsel %vm3531_vm3, %v3602_v23, %v3632_v51 }
 0x384   :  { %1715 = vmatpush1.msra.mxu1 %v3259_v0 }
 0x385   :  { %1716 = vmatprep.subr.mxu1 %v3263_v5 }
 0x386   :  { %1717 = vmatpush1.msra.mxu1 %v3268_v7 }
 0x387   :  { %1718 = vmatprep.subr.mxu1 %v3272_v9 }
 0x388   :  { %1719 = vmatpush1.msra.mxu1 %v3275_v10 }
 0x389   :  { %1720 = vmatprep.subr.mxu1 %v3278_v12 }
 0x38a   :  { %1721 = vmatpush1.msra.mxu1 %v4149_v43  ;;  %v3892_v43 = vld [vmem:[#allocation11 + $0x38] sm:$0xff] }
 0x38b   :  { %1940 = vmatprep.subr.mxu1 %v3848_v50 }
 0x43b   :  { %v1639_v52 = vpop.f32.mrf.mxu1 }
 0x43c   :  { %v1644_v55 = vadd.f32 %v1639_v52, %v4150_v54  ;;  %v3895_v52 = vld [vmem:[#allocation11 + $0x30] sm:$0xff]  ;;  %v3898_v54 = vld [vmem:[#allocation11 + $0x28] sm:$0xff] }
 0x43d   :  { %v1641_v57 = vpop.f32.mrf.mxu1 }
 0x43e   :  { %v2645_v62 = vmul.f32 -1.442695, %v1644_v55  ;;  %v1645_v0 = vadd.f32 %v1641_v57, %v4151_v63  ;;  %v3901_v55 = vld [vmem:[#allocation11 + $0x20] sm:$0xff]  ;;  %v3904_v57 = vld [vmem:[#allocation11 + $0x18] sm:$0xff]  ;;  %v3910_v63 = vld [vmem:[#allocation11 + $0x8] sm:$0xff] }
 0x440   :  { %2863 = vpow2.f32 %v2645_v62  ;;  %v2646_v5 = vmul.f32 -1.442695, %v1645_v0  ;;  %v3907_v62 = vld [vmem:[#allocation11 + $0x10] sm:$0xff] }
 0x442   :  { %2865 = vpow2.f32 %v2646_v5 }
 0x443   :  { %2867 = vtanh.f32 %v1645_v0  ;;  %v3913_v0 = vld [vmem:[#allocation11] sm:$0xff] }
 0x44d   :  { %v2864_v7 = vpop.eup %2863 }
 0x44e   :  { %v1654_v10 = vadd.f32 1.0, %v2864_v7  ;;  %v4152_v7 = vsel %vm3514_vm2, %v3649_v4, %v3675_v11 }
 0x44f   :  { %v2866_v9 = vpop.eup %2865 }
 0x450   :  { %v1655_v12 = vadd.f32 1.0, %v2866_v9  ;;  %v2868_v3 = vpop.eup %2867 }
 0x452   :  { %2869 = vrcp.f32 %v1655_v12 }
 0x453   :  { %2871 = vrcp.f32 %v1654_v10 }
 0x45f   :  { %v2870_v8 = vpop.eup %2869 }
 0x460   :  { %v2872_v24 = vpop.eup %2871  ;;  %v1661_v32 = vsel %vm1428_vm4, %v2868_v3, %v2870_v8 }
 0x461   :  { %v1663_v2 = vmul.f32 %v2872_v24, %v1661_v32  ;;  %v1662_v41 = vmul.f32 %v2872_v24, %v1551_v29  ;;  %v3883_v29 = vld [vmem:[#allocation11 + $0x50] sm:$0xff] }
 0x463   :  { %1665 = vrot.lane.b32.xlu0 %v1663_v2, %s3101_s2 }
 0x4d5   :  { %v1666_v30 = vpop.permute.xlu0 %1665 }
 0x4d6   :  { %v1668_v22 = vadd.f32 %v1666_v30, %v1662_v41 }
 0x4d8   :  { %2873 = vtanh.f32 %v1668_v22 }
 0x4e5   :  { %v2874_v28 = vpop.eup %2873 }
 0x4e6   :  { %v3864_v44 = vmul.f32 %v2874_v28, %v1661_v32 }
 0x4e8   :  { %1672 = vrot.lane.b32.xlu1 %v3864_v44, %s3101_s2 }
 0x55a   :  { %v1673_v14 = vpop.permute.xlu1 %1672 }
 0x55b   :  { %1676 = vst.msk [vmem:[#allocation3 + $0x8] sm:$0xff] %vm1558_vm5, %v1673_v14  ;;  %2647 = vmatmul.mubr.msk.f32.vlgmr.msra.gmra.mxu1 %vm920_vm15, %v1673_v14 }
 0x55c   :  { %1941 = vmatpush1.msra.mxu1 %v3870_v60  ;;  %1988 = vmatprep.mubr.f32.mxu1 %v4148_v15 }
 0x55d   :  { %1942 = vmatprep.subr.mxu1 %v3874_v34 }
 0x55e   :  { %1943 = vmatpush1.msra.mxu1 %v3877_v37 }
 0x55f   :  { %1944 = vmatprep.subr.mxu1 %v3880_v31 }
 0x560   :  { %1945 = vmatpush1.msra.mxu1 %v3883_v29 }
 0x561   :  { %1946 = vmatprep.subr.mxu1 %v3886_v39 }
 0x562   :  { %1947 = vmatpush1.msra.mxu1 %v3889_v56 }
 0x563   :  { %1948 = vmatprep.subr.mxu1 %v3892_v43 }
 0x564   :  { %1949 = vmatpush1.msra.mxu1 %v3895_v52 }
 0x565   :  { %1950 = vmatprep.subr.mxu1 %v3898_v54 }
 0x566   :  { %1951 = vmatpush1.msra.mxu1 %v3901_v55 }
 0x567   :  { %1952 = vmatprep.subr.mxu1 %v3904_v57 }
 0x568   :  { %1953 = vmatpush1.msra.mxu1 %v3907_v62 }
 0x569   :  { %1954 = vmatprep.subr.mxu1 %v3910_v63 }
 0x56a   :  { %1955 = vmatpush1.msra.mxu1 %v3913_v0 }
 0x56b   :  { %2174 = vmatprep.subr.mxu1 %v3848_v50 }
 0x61b   :  { %v1756_v5 = vpop.f32.mrf.mxu1 }
 0x61c   :  { %v1761_v9 = vadd.f32 %v1756_v5, %v4152_v7 }
 0x61d   :  { %v1758_v10 = vpop.f32.mrf.mxu1 }
 0x61e   :  { %v2648_v12 = vmul.f32 -1.442695, %v1761_v9  ;;  %v1762_v3 = vadd.f32 %v1758_v10, %v1687_v49 }
 0x620   :  { %2875 = vpow2.f32 %v2648_v12  ;;  %v2649_v8 = vmul.f32 -1.442695, %v1762_v3 }
 0x622   :  { %2877 = vpow2.f32 %v2649_v8 }
 0x623   :  { %2879 = vtanh.f32 %v1762_v3 }
 0x62d   :  { %v2876_v24 = vpop.eup %2875 }
 0x62e   :  { %v1771_v2 = vadd.f32 1.0, %v2876_v24 }
 0x62f   :  { %v2878_v32 = vpop.eup %2877 }
 0x630   :  { %v1772_v41 = vadd.f32 1.0, %v2878_v32  ;;  %v2880_v30 = vpop.eup %2879 }
 0x632   :  { %2881 = vrcp.f32 %v1772_v41 }
 0x633   :  { %2883 = vrcp.f32 %v1771_v2 }
 0x63f   :  { %v2882_v28 = vpop.eup %2881 }
 0x640   :  { %v2884_v14 = vpop.eup %2883  ;;  %v1778_v5 = vsel %vm1428_vm4, %v2880_v30, %v2882_v28 }
 0x641   :  { %v1780_v7 = vmul.f32 %v2884_v14, %v1778_v5  ;;  %v1779_v49 = vmul.f32 %v2884_v14, %v1668_v22 }
 0x643   :  { %1782 = vrot.lane.b32.xlu0 %v1780_v7, %s3101_s2 }
 0x6b5   :  { %v1783_v9 = vpop.permute.xlu0 %1782 }
 0x6b6   :  { %v1785_v10 = vadd.f32 %v1783_v9, %v1779_v49 }
 0x6b8   :  { %2885 = vtanh.f32 %v1785_v10 }
 0x6c5   :  { %v2886_v12 = vpop.eup %2885 }
 0x6c6   :  { %v3930_v8 = vmul.f32 %v2886_v12, %v1778_v5 }
 0x6c8   :  { %1789 = vrot.lane.b32.xlu1 %v3930_v8, %s3101_s2 }
 0x73a   :  { %v1790_v3 = vpop.permute.xlu1 %1789 }
 0x73b   :  { %1793 = vst.msk [vmem:[#allocation3 + $0x10] sm:$0xff] %vm1558_vm5, %v1790_v3  ;;  %2650 = vmatmul.mubr.msk.f32.vlgmr.msra.gmra.mxu0 %vm920_vm15, %v1790_v3 }
 0x73c   :  { %2058 = vmatpush1.msra.mxu0 %v3870_v60  ;;  %2105 = vmatprep.mubr.f32.mxu0 %v4148_v15 }
 0x73d   :  { %2059 = vmatprep.subr.mxu0 %v3874_v34 }
 0x73e   :  { %2060 = vmatpush1.msra.mxu0 %v3877_v37 }
 0x73f   :  { %2061 = vmatprep.subr.mxu0 %v3880_v31 }
 0x740   :  { %2062 = vmatpush1.msra.mxu0 %v3883_v29 }
 0x741   :  { %2063 = vmatprep.subr.mxu0 %v3886_v39 }
 0x742   :  { %2064 = vmatpush1.msra.mxu0 %v3889_v56 }
 0x743   :  { %2065 = vmatprep.subr.mxu0 %v3892_v43 }
 0x744   :  { %2066 = vmatpush1.msra.mxu0 %v3895_v52 }
 0x745   :  { %2067 = vmatprep.subr.mxu0 %v3898_v54 }
 0x746   :  { %2068 = vmatpush1.msra.mxu0 %v3901_v55 }
 0x747   :  { %2069 = vmatprep.subr.mxu0 %v3904_v57 }
 0x748   :  { %2070 = vmatpush1.msra.mxu0 %v3907_v62 }
 0x749   :  { %2071 = vmatprep.subr.mxu0 %v3910_v63 }
 0x74a   :  { %2072 = vmatpush1.msra.mxu0 %v3913_v0 }
 0x74b   :  { %2291 = vmatprep.subr.mxu0 %v3848_v50 }
 0x7fb   :  { %v1873_v22 = vpop.f32.mrf.mxu0 }
 0x7fc   :  { %v1878_v24 = vadd.f32 %v1873_v22, %v1803_v46 }
 0x7fd   :  { %v1875_v32 = vpop.f32.mrf.mxu0 }
 0x7fe   :  { %v2651_v2 = vmul.f32 -1.442695, %v1878_v24  ;;  %v1879_v41 = vadd.f32 %v1875_v32, %v1804_v38 }
 0x800   :  { %2887 = vpow2.f32 %v2651_v2  ;;  %v2652_v30 = vmul.f32 -1.442695, %v1879_v41 }
 0x802   :  { %2889 = vpow2.f32 %v2652_v30 }
 0x803   :  { %2891 = vtanh.f32 %v1879_v41 }
 0x80d   :  { %v2888_v28 = vpop.eup %2887 }
 0x80e   :  { %v1888_v14 = vadd.f32 1.0, %v2888_v28 }
 0x80f   :  { %v2890_v50 = vpop.eup %2889 }
 0x810   :  { %v1889_v5 = vadd.f32 1.0, %v2890_v50  ;;  %v2892_v7 = vpop.eup %2891 }
 0x812   :  { %2893 = vrcp.f32 %v1889_v5 }
 0x813   :  { %2895 = vrcp.f32 %v1888_v14 }
 0x81f   :  { %v2894_v46 = vpop.eup %2893 }
 0x820   :  { %v2896_v49 = vpop.eup %2895  ;;  %v1895_v9 = vsel %vm1428_vm4, %v2892_v7, %v2894_v46 }
 0x821   :  { %v1897_v12 = vmul.f32 %v2896_v49, %v1895_v9  ;;  %v1896_v38 = vmul.f32 %v2896_v49, %v1785_v10 }
 0x823   :  { %1899 = vrot.lane.b32.xlu0 %v1897_v12, %s3101_s2 }
 0x895   :  { %v1900_v3 = vpop.permute.xlu0 %1899 }
 0x896   :  { %v1902_v22 = vadd.f32 %v1900_v3, %v1896_v38 }
 0x898   :  { %2897 = vtanh.f32 %v1902_v22 }
 0x8a5   :  { %v2898_v24 = vpop.eup %2897 }
 0x8a6   :  { %v3966_v32 = vmul.f32 %v2898_v24, %v1895_v9 }
 0x8a8   :  { %1906 = vrot.lane.b32.xlu1 %v3966_v32, %s3101_s2 }
 0x91a   :  { %v1907_v2 = vpop.permute.xlu1 %1906 }
 0x91b   :  { %1910 = vst.msk [vmem:[#allocation3 + $0x18] sm:$0xff] %vm1558_vm5, %v1907_v2  ;;  %2653 = vmatmul.mubr.msk.f32.vlgmr.msra.gmra.mxu1 %vm920_vm15, %v1907_v2 }
 0x91c   :  { %2175 = vmatpush1.msra.mxu1 %v3870_v60  ;;  %2222 = vmatprep.mubr.f32.mxu1 %v4148_v15 }
 0x91d   :  { %2176 = vmatprep.subr.mxu1 %v3874_v34 }
 0x91e   :  { %2177 = vmatpush1.msra.mxu1 %v3877_v37 }
 0x91f   :  { %2178 = vmatprep.subr.mxu1 %v3880_v31 }
 0x920   :  { %2179 = vmatpush1.msra.mxu1 %v3883_v29 }
 0x921   :  { %2180 = vmatprep.subr.mxu1 %v3886_v39 }
 0x922   :  { %2181 = vmatpush1.msra.mxu1 %v3889_v56 }
 0x923   :  { %2182 = vmatprep.subr.mxu1 %v3892_v43 }
 0x924   :  { %2183 = vmatpush1.msra.mxu1 %v3895_v52 }
 0x925   :  { %2184 = vmatprep.subr.mxu1 %v3898_v54 }
 0x926   :  { %2185 = vmatpush1.msra.mxu1 %v3901_v55 }
 0x927   :  { %2186 = vmatprep.subr.mxu1 %v3904_v57 }
 0x928   :  { %2187 = vmatpush1.msra.mxu1 %v3907_v62 }
 0x929   :  { %2188 = vmatprep.subr.mxu1 %v3910_v63 }
 0x92a   :  { %2189 = vmatpush1.msra.mxu1 %v3913_v0 }
 0x9db   :  { %v1990_v10 = vpop.f32.mrf.mxu1 }
 0x9dc   :  { %v1995_v41 = vadd.f32 %v1990_v10, %v1920_v61 }
 0x9dd   :  { %v1992_v30 = vpop.f32.mrf.mxu1 }
 0x9de   :  { %v2654_v28 = vmul.f32 -1.442695, %v1995_v41  ;;  %v1996_v50 = vadd.f32 %v1992_v30, %v1921_v20 }
 0x9e0   :  { %2899 = vpow2.f32 %v2654_v28  ;;  %v2655_v14 = vmul.f32 -1.442695, %v1996_v50 }
 0x9e2   :  { %2901 = vpow2.f32 %v2655_v14 }
 0x9e3   :  { %2903 = vtanh.f32 %v1996_v50 }
 0x9ed   :  { %v2900_v5 = vpop.eup %2899 }
 0x9ee   :  { %v2005_v46 = vadd.f32 1.0, %v2900_v5 }
 0x9ef   :  { %v2902_v7 = vpop.eup %2901 }
 0x9f0   :  { %v2006_v49 = vadd.f32 1.0, %v2902_v7  ;;  %v2904_v16 = vpop.eup %2903 }
 0x9f2   :  { %2905 = vrcp.f32 %v2006_v49 }
 0x9f3   :  { %2907 = vrcp.f32 %v2005_v46 }
 0x9ff   :  { %v2906_v19 = vpop.eup %2905 }
 0xa00   :  { %v2908_v61 = vpop.eup %2907  ;;  %v2012_v9 = vsel %vm1428_vm4, %v2904_v16, %v2906_v19 }
 0xa01   :  { %v2014_v12 = vmul.f32 %v2908_v61, %v2012_v9  ;;  %v2013_v45 = vmul.f32 %v2908_v61, %v1902_v22 }
 0xa03   :  { %2016 = vrot.lane.b32.xlu0 %v2014_v12, %s3101_s2 }
 0xa75   :  { %v2017_v1 = vpop.permute.xlu0 %2016 }
 0xa76   :  { %v2019_v20 = vadd.f32 %v2017_v1, %v2013_v45 }
 0xa78   :  { %2909 = vtanh.f32 %v2019_v20 }
 0xa85   :  { %v2910_v38 = vpop.eup %2909 }
 0xa86   :  { %v4001_v3 = vmul.f32 %v2910_v38, %v2012_v9 }
 0xa88   :  { %2023 = vrot.lane.b32.xlu1 %v4001_v3, %s3101_s2 }
 0xafa   :  { %v2024_v24 = vpop.permute.xlu1 %2023 }
 0xafb   :  { %2027 = vst.msk [vmem:[#allocation3 + $0x20] sm:$0xff] %vm1558_vm5, %v2024_v24  ;;  %2656 = vmatmul.mubr.msk.f32.vlgmr.msra.gmra.mxu0 %vm920_vm15, %v2024_v24 }
 0xafc   :  { %2292 = vmatpush1.msra.mxu0 %v3870_v60  ;;  %2339 = vmatprep.mubr.f32.mxu0 %v4148_v15 }
 0xafd   :  { %2293 = vmatprep.subr.mxu0 %v3874_v34 }
 0xafe   :  { %2294 = vmatpush1.msra.mxu0 %v3877_v37 }
 0xaff   :  { %2295 = vmatprep.subr.mxu0 %v3880_v31 }
 0xb00   :  { %2296 = vmatpush1.msra.mxu0 %v3883_v29 }
 0xb01   :  { %2297 = vmatprep.subr.mxu0 %v3886_v39 }
 0xb02   :  { %2298 = vmatpush1.msra.mxu0 %v3889_v56 }
 0xb03   :  { %2299 = vmatprep.subr.mxu0 %v3892_v43 }
 0xb04   :  { %2300 = vmatpush1.msra.mxu0 %v3895_v52 }
 0xb05   :  { %2301 = vmatprep.subr.mxu0 %v3898_v54 }
 0xb06   :  { %2302 = vmatpush1.msra.mxu0 %v3901_v55 }
 0xb07   :  { %2303 = vmatprep.subr.mxu0 %v3904_v57 }
 0xb08   :  { %2304 = vmatpush1.msra.mxu0 %v3907_v62 }
 0xb09   :  { %2305 = vmatprep.subr.mxu0 %v3910_v63 }
 0xb0a   :  { %2306 = vmatpush1.msra.mxu0 %v3913_v0 }
 0xbbb   :  { %v2107_v15 = vpop.f32.mrf.mxu0 }
 0xbbc   :  { %v2112_v60 = vadd.f32 %v2107_v15, %v2037_v18 }
 0xbbd   :  { %v2109_v34 = vpop.f32.mrf.mxu0 }
 0xbbe   :  { %v2657_v37 = vmul.f32 -1.442695, %v2112_v60  ;;  %v2113_v31 = vadd.f32 %v2109_v34, %v2038_v36 }
 0xbc0   :  { %2911 = vpow2.f32 %v2657_v37  ;;  %v2658_v29 = vmul.f32 -1.442695, %v2113_v31 }
 0xbc2   :  { %2913 = vpow2.f32 %v2658_v29  ;;  %v2446_v29 = vld [vmem:[#allocation13 + $0x38] sm:$0xff] }
 0xbc3   :  { %2915 = vtanh.f32 %v2113_v31  ;;  %2778 = vmatprep.subr.mxu1 %v2446_v29 }
 0xbcd   :  { %v2912_v39 = vpop.eup %2911 }
 0xbce   :  { %v2122_v43 = vadd.f32 1.0, %v2912_v39  ;;  %v2445_v39 = vld [vmem:[#allocation13 + $0x30] sm:$0xff] }
 0xbcf   :  { %v2914_v56 = vpop.eup %2913 }
 0xbd0   :  { %v2123_v52 = vadd.f32 1.0, %v2914_v56  ;;  %v2916_v11 = vpop.eup %2915  ;;  %v2444_v56 = vld [vmem:[#allocation13 + $0x28] sm:$0xff] }
 0xbd2   :  { %2917 = vrcp.f32 %v2123_v52  ;;  %v2442_v52 = vld [vmem:[#allocation13 + $0x18] sm:$0xff] }
 0xbd3   :  { %2919 = vrcp.f32 %v2122_v43  ;;  %v2443_v43 = vld [vmem:[#allocation13 + $0x20] sm:$0xff] }
 0xbdf   :  { %v2918_v4 = vpop.eup %2917 }
 0xbe0   :  { %v2920_v18 = vpop.eup %2919  ;;  %v2129_v54 = vsel %vm1428_vm4, %v2916_v11, %v2918_v4  ;;  %v2441_v11 = vld [vmem:[#allocation13 + $0x10] sm:$0xff]  ;;  %v2439_v4 = vld [vmem:[#allocation13] sm:$0xff] }
 0xbe1   :  { %v2131_v55 = vmul.f32 %v2920_v18, %v2129_v54  ;;  %v2130_v48 = vmul.f32 %v2920_v18, %v2019_v20 }
 0xbe3   :  { %2133 = vrot.lane.b32.xlu0 %v2131_v55, %s3101_s2 }
 0xc55   :  { %v2134_v27 = vpop.permute.xlu0 %2133 }
 0xc56   :  { %v2136_v36 = vadd.f32 %v2134_v27, %v2130_v48 }
 0xc58   :  { %2921 = vtanh.f32 %v2136_v36 }
 0xc65   :  { %v2922_v57 = vpop.eup %2921 }
 0xc66   :  { %v4036_v62 = vmul.f32 %v2922_v57, %v2129_v54 }
 0xc68   :  { %2140 = vrot.lane.b32.xlu1 %v4036_v62, %s3101_s2 }
 0xcda   :  { %v2141_v63 = vpop.permute.xlu1 %2140 }
 0xcdb   :  { %2144 = vst.msk [vmem:[#allocation3 + $0x28] sm:$0xff] %vm1558_vm5, %v2141_v63  ;;  %2659 = vmatmul.mubr.msk.f32.vlgmr.msra.gmra.mxu1 %vm920_vm15, %v2141_v63 }
 0xcdc   :  { %2779 = vmatpush3.msra.mxu1 %v2446_v29 }
 0xcdd   :  { %2780 = vmatprep.subr.mxu1 %v2445_v39 }
 0xcde   :  { %2781 = vmatpush3.msra.mxu1 %v2445_v39 }
 0xcdf   :  { %2782 = vmatprep.subr.mxu1 %v2444_v56 }
 0xce0   :  { %2783 = vmatpush3.msra.mxu1 %v2444_v56 }
 0xce1   :  { %2784 = vmatprep.subr.mxu1 %v2443_v43 }
 0xce2   :  { %2785 = vmatpush3.msra.mxu1 %v2443_v43 }
 0xce3   :  { %2786 = vmatprep.subr.mxu1 %v2442_v52 }
 0xce4   :  { %2787 = vmatpush3.msra.mxu1 %v2442_v52 }
 0xce5   :  { %2788 = vmatprep.subr.mxu1 %v2441_v11 }
 0xce6   :  { %2789 = vmatpush3.msra.mxu1 %v2441_v11 }
 0xd9b   :  { %v2224_v0 = vpop.f32.mrf.mxu1 }
 0xd9c   :  { %v2229_v22 = vadd.f32 %v2224_v0, %v2154_v17 }
 0xd9d   :  { %v2226_v2 = vpop.f32.mrf.mxu1 }
 0xd9e   :  { %v2660_v10 = vmul.f32 -1.442695, %v2229_v22  ;;  %v2230_v41 = vadd.f32 %v2226_v2, %v2155_v6 }
 0xda0   :  { %2923 = vpow2.f32 %v2660_v10  ;;  %v2661_v30 = vmul.f32 -1.442695, %v2230_v41 }
 0xda2   :  { %2925 = vpow2.f32 %v2661_v30  ;;  %v2384_v30 = vld [vmem:[#allocation3 + $0x8] sm:$0xff] }
 0xda3   :  { %2927 = vtanh.f32 %v2230_v41  ;;  %v2383_v41 = vld [vmem:[#allocation3] sm:$0xff] }
 0xdad   :  { %v2924_v28 = vpop.eup %2923 }
 0xdae   :  { %v2239_v14 = vadd.f32 1.0, %v2924_v28 }
 0xdaf   :  { %v2926_v50 = vpop.eup %2925 }
 0xdb0   :  { %v2240_v5 = vadd.f32 1.0, %v2926_v50  ;;  %v2928_v33 = vpop.eup %2927 }
 0xdb2   :  { %2929 = vrcp.f32 %v2240_v5  ;;  %v2385_v5 = vld [vmem:[#allocation3 + $0x10] sm:$0xff] }
 0xdb3   :  { %2931 = vrcp.f32 %v2239_v14 }
 0xdbf   :  { %v2930_v59 = vpop.eup %2929 }
 0xdc0   :  { %v2932_v17 = vpop.eup %2931  ;;  %v2246_v7 = vsel %vm1428_vm4, %v2928_v33, %v2930_v59 }
 0xdc1   :  { %v2248_v46 = vmul.f32 %v2932_v17, %v2246_v7  ;;  %v2247_v23 = vmul.f32 %v2932_v17, %v2136_v36  ;;  %v2386_v17 = vld [vmem:[#allocation3 + $0x18] sm:$0xff] }
 0xdc3   :  { %2250 = vrot.lane.b32.xlu0 %v2248_v46, %s3101_s2  ;;  %v2387_v46 = vld [vmem:[#allocation3 + $0x20] sm:$0xff] }
 0xe35   :  { %v2251_v51 = vpop.permute.xlu0 %2250 }
 0xe36   :  { %v2253_v6 = vadd.f32 %v2251_v51, %v2247_v23 }
 0xe38   :  { %2933 = vtanh.f32 %v2253_v6 }
 0xe45   :  { %v2934_v49 = vpop.eup %2933 }
 0xe46   :  { %v2255_v16 = vmul.f32 %v2934_v49, %v2246_v7  ;;  %v2388_v49 = vld [vmem:[#allocation3 + $0x28] sm:$0xff] }
 0xe48   :  { %2257 = vrot.lane.b32.xlu1 %v2255_v16, %s3101_s2 }
 0xeba   :  { %v2258_v19 = vpop.permute.xlu1 %2257 }
 0xebb   :  { %2261 = vst.msk [vmem:[#allocation3 + $0x30] sm:$0xff] %vm1558_vm5, %v2258_v19  ;;  %2662 = vmatmul.mubr.msk.f32.vlgmr.msra.gmra.mxu0 %vm920_vm15, %v2258_v19 }
 0xec2   :  { %v2389_v19 = vld [vmem:[#allocation3 + $0x30] sm:$0xff] }
 0xf7b   :  { %v2341_v61 = vpop.f32.mrf.mxu0 }
 0xf7c   :  { %v2346_v9 = vadd.f32 %v2341_v61, %v2271_v40 }
 0xf7d   :  { %v2343_v12 = vpop.f32.mrf.mxu0 }
 0xf7e   :  { %v2663_v45 = vmul.f32 -1.442695, %v2346_v9  ;;  %v2347_v1 = vadd.f32 %v2343_v12, %v2272_v47 }
 0xf80   :  { %2935 = vpow2.f32 %v2663_v45  ;;  %v2664_v20 = vmul.f32 -1.442695, %v2347_v1 }
 0xf82   :  { %2937 = vpow2.f32 %v2664_v20  ;;  %v2665_v20 = vld [vmem:[%s4134_s6] ss:$0 sm:$0xff]  ;;  %s2596_s6 = sshll.u32 %s3103_s9, 4  ;;  %s2597_s6 = int_to_ptr.vmem [resolvable:$true] %s2596_s6 }
 0xf83   :  { %2939 = vtanh.f32 %v2347_v1  ;;  %s3063_s10 = scalar_lea.vmem %s2597_s6, 1024  ;;  %p3068_p12 = scmp.lt.s32.totalorder %s2597_s6, %s2597_s6 }
 0xf84   :  { %p3064_p11 = scmp.ne.s32.totalorder %s2597_s6, %s3063_s10  ;;  %p3069_p13 = scmp.lt.s32.totalorder %s3063_s10, %s3063_s10 }
 0xf86   :  { %p3070_p0 = por %p3069_p13, %p3068_p12 }
 0xf88   :  { %p3071_p1 = pnand %p3070_p0, %p3064_p11 }
 0xf8d   :  { %v2936_v38 = vpop.eup %2935 }
 0xf8e   :  { %v2356_v15 = vadd.f32 1.0, %v2936_v38 }
 0xf8f   :  { %v2938_v24 = vpop.eup %2937 }
 0xf90   :  { %v2357_v60 = vadd.f32 1.0, %v2938_v24  ;;  %v2940_v35 = vpop.eup %2939 }
 0xf92   :  { %2941 = vrcp.f32 %v2357_v60 }
 0xf93   :  { %2943 = vrcp.f32 %v2356_v15 }
 0xf9f   :  { %v2942_v21 = vpop.eup %2941 }
 0xfa0   :  { %v2944_v26 = vpop.eup %2943  ;;  %v2363_v53 = vsel %vm1428_vm4, %v2940_v35, %v2942_v21 }
 0xfa1   :  { %v2365_v40 = vmul.f32 %v2944_v26, %v2363_v53  ;;  %v2364_v58 = vmul.f32 %v2944_v26, %v2253_v6 }
 0xfa3   :  { %2367 = vrot.lane.b32.xlu0 %v2365_v40, %s3101_s2 }
 0xfa7   :  { %2262 = vrot.lane.b32.xlu0 %v2255_v16, %s3102_s4 }
 0xfab   :  { %2028 = vrot.lane.b32.xlu0 %v4001_v3, %s3102_s4 }
 0xfaf   :  { %1794 = vrot.lane.b32.xlu0 %v3930_v8, %s3102_s4 }
 0xfb3   :  { %1560 = vrot.lane.b32.xlu0 %v3826_v42, %s3102_s4 }
0x1015   :  { %v2368_v13 = vpop.permute.xlu0 %2367 }
0x1016   :  { %v2370_v47 = vadd.f32 %v2368_v13, %v2364_v58 }
0x1018   :  { %2945 = vtanh.f32 %v2370_v47 }
0x1019   :  { %v2263_v25 = vpop.permute.xlu0 %2262 }
0x101a   :  { %2266 = vst.msk [vmem:[#allocation4 + $0x8] sm:$0xff] %vm1558_vm5, %v2263_v25 }
0x101d   :  { %v2029_v34 = vpop.permute.xlu0 %2028 }
0x101e   :  { %2032 = vst.msk [vmem:[#allocation4 + $0x18] sm:$0xff] %vm1558_vm5, %v2029_v34 }
0x1021   :  { %v1795_v37 = vpop.permute.xlu0 %1794  ;;  %v2392_v31 = vld [vmem:[#allocation4 + $0x8] sm:$0xff] }
0x1022   :  { %1798 = vst.msk [vmem:[#allocation4 + $0x28] sm:$0xff] %vm1558_vm5, %v1795_v37  ;;  %2409 = vrot.lane.b32.xlu0 %v2392_v31, %s3102_s4 }
0x1025   :  { %v2946_v8 = vpop.eup %2945  ;;  %v1561_v3 = vpop.permute.xlu0 %1560  ;;  %v2394_v63 = vld [vmem:[#allocation4 + $0x18] sm:$0xff] }
0x1026   :  { %1564 = vst.msk [vmem:[#allocation4 + $0x38] sm:$0xff] %vm1558_vm5, %v1561_v3  ;;  %v2372_v42 = vmul.f32 %v2946_v8, %v2363_v53 }
0x1028   :  { %2379 = vrot.lane.b32.xlu1 %v2372_v42, %s3102_s4  ;;  %2374 = vrot.lane.b32.xlu0 %v2372_v42, %s3101_s2 }
0x1029   :  { %v2396_v22 = vld [vmem:[#allocation4 + $0x28] sm:$0xff] }
0x102c   :  { %2145 = vrot.lane.b32.xlu1 %v4036_v62, %s3102_s4 }
0x102d   :  { %v2398_v2 = vld [vmem:[#allocation4 + $0x38] sm:$0xff] }
0x1030   :  { %1911 = vrot.lane.b32.xlu1 %v3966_v32, %s3102_s4  ;;  %v2440_v32 = vld [vmem:[#allocation13 + $0x8] sm:$0xff] }
0x1031   :  { %2790 = vmatprep.subr.mxu1 %v2440_v32 }
0x1032   :  { %2791 = vmatpush3.msra.mxu1 %v2440_v32 }
0x1033   :  { %2792 = vmatprep.subr.mxu1 %v2439_v4 }
0x1034   :  { %1677 = vrot.lane.b32.xlu1 %v3864_v44, %s3102_s4  ;;  %2793 = vmatpush3.msra.mxu1 %v2439_v4 }
0x1094   :  { %v2410_v44 = vpop.permute.xlu0 %2409 }
0x1095   :  { %v2432_v50 = vsel %vm1558_vm5, %v2384_v30, %v2410_v44 }
0x109a   :  { %v2380_v18 = vpop.permute.xlu1 %2379  ;;  %v2375_v54 = vpop.permute.xlu0 %2374 }
0x109b   :  { %2382 = vst.msk [vmem:[#allocation4] sm:$0xff] %vm1558_vm5, %v2380_v18  ;;  %2378 = vst.msk [vmem:[#allocation3 + $0x38] sm:$0xff] %vm1558_vm5, %v2375_v54 }
0x109e   :  { %v2146_v55 = vpop.permute.xlu1 %2145 }
0x109f   :  { %2149 = vst.msk [vmem:[#allocation4 + $0x10] sm:$0xff] %vm1558_vm5, %v2146_v55 }
0x10a2   :  { %v1912_v48 = vpop.permute.xlu1 %1911  ;;  %v2391_v27 = vld [vmem:[#allocation4] sm:$0xff]  ;;  %v2390_v45 = vld [vmem:[#allocation3 + $0x38] sm:$0xff] }
0x10a3   :  { %1915 = vst.msk [vmem:[#allocation4 + $0x20] sm:$0xff] %vm1558_vm5, %v1912_v48  ;;  %2407 = vrot.lane.b32.xlu1 %v2391_v27, %s3102_s4 }
0x10a6   :  { %v1678_v36 = vpop.permute.xlu1 %1677  ;;  %v2393_v57 = vld [vmem:[#allocation4 + $0x10] sm:$0xff] }
0x10a7   :  { %1681 = vst.msk [vmem:[#allocation4 + $0x30] sm:$0xff] %vm1558_vm5, %v1678_v36  ;;  %2411 = vrot.lane.b32.xlu1 %v2393_v57, %s3102_s4 }
0x10aa   :  { %v2395_v62 = vld [vmem:[#allocation4 + $0x20] sm:$0xff] }
0x10ab   :  { %2415 = vrot.lane.b32.xlu0 %v2395_v62, %s3102_s4  ;;  %2413 = vrot.lane.b32.xlu1 %v2394_v63, %s3102_s4 }
0x10ae   :  { %v2397_v0 = vld [vmem:[#allocation4 + $0x30] sm:$0xff] }
0x10af   :  { %2419 = vrot.lane.b32.xlu0 %v2397_v0, %s3102_s4  ;;  %2417 = vrot.lane.b32.xlu1 %v2396_v22, %s3102_s4 }
0x10b3   :  { %2421 = vrot.lane.b32.xlu1 %v2398_v2, %s3102_s4 }
0x1115   :  { %v2408_v10 = vpop.permute.xlu1 %2407 }
0x1116   :  { %v2431_v28 = vsel %vm1558_vm5, %v2383_v41, %v2408_v10 }
0x1117   :  { %2794 = vmatprep.mubr.msk.f32.mxu1 %vm920_vm15, %v2431_v28 }
0x1118   :  { %2795 = vmatmul.mubr.msk.f32.vlgmr.msra.gmra.mxu1 %vm920_vm15, %v2432_v50 }
0x1119   :  { %v2412_v14 = vpop.permute.xlu1 %2411 }
0x111a   :  { %v2433_v33 = vsel %vm1558_vm5, %v2385_v5, %v2412_v14 }
0x111b   :  { %2797 = vmatprep.mubr.msk.f32.mxu1 %vm920_vm15, %v2433_v33 }
0x111d   :  { %v2414_v59 = vpop.permute.xlu1 %2413  ;;  %v2416_v7 = vpop.permute.xlu0 %2415 }
0x111e   :  { %v2434_v23 = vsel %vm1558_vm5, %v2386_v17, %v2414_v59  ;;  %v2435_v51 = vsel %vm1558_vm5, %v2387_v46, %v2416_v7 }
0x111f   :  { %2798 = vmatmul.mubr.msk.f32.gmra.mxu1 %vm920_vm15, %v2434_v23 }
0x1120   :  { %2800 = vmatprep.mubr.msk.f32.mxu1 %vm920_vm15, %v2435_v51 }
0x1121   :  { %v2418_v6 = vpop.permute.xlu1 %2417  ;;  %v2420_v16 = vpop.permute.xlu0 %2419 }
0x1122   :  { %v2436_v61 = vsel %vm1558_vm5, %v2388_v49, %v2418_v6  ;;  %v2437_v9 = vsel %vm1558_vm5, %v2389_v19, %v2420_v16 }
0x1123   :  { %2801 = vmatmul.mubr.msk.f32.gmra.mxu1 %vm920_vm15, %v2436_v61 }
0x1124   :  { %2803 = vmatprep.mubr.msk.f32.mxu1 %vm920_vm15, %v2437_v9 }
0x1125   :  { %v2422_v12 = vpop.permute.xlu1 %2421 }
0x1126   :  { %v2438_v1 = vsel %vm1558_vm5, %v2390_v45, %v2422_v12 }
0x1127   :  { %2804 = vmatmul.mubr.msk.f32.gmra.mxu1 %vm920_vm15, %v2438_v1 }
0x11d8   :  { %v2796_v38 = vpop.f32.mrf.mxu1 }
0x11d9   :  { %v2550_v24 = vadd.f32 %v2796_v38, %v2665_v20 }
0x11da   :  { %v2544_v15 = vpop.f32.mrf.mxu1 }
0x11db   :  { %2584 = vst [vmem:[#allocation14 + $0x8] sm:$0xff] %v2550_v24  ;;  %v2545_v60 = vadd.f32 %v2665_v20, %v2544_v15 }
0x11dd   :  { %2583 = vst [vmem:[#allocation14] sm:$0xff] %v2545_v60 }
0x11df   :  { %v2799_v35 = vpop.f32.mrf.mxu1 }
0x11e0   :  { %v2560_v21 = vadd.f32 %v2799_v35, %v2665_v20 }
0x11e1   :  { %v2554_v26 = vpop.f32.mrf.mxu1 }
0x11e2   :  { %2586 = vst [vmem:[#allocation14 + $0x18] sm:$0xff] %v2560_v21  ;;  %v2555_v53 = vadd.f32 %v2665_v20, %v2554_v26 }
0x11e3   :  { %v2802_v40 = vpop.f32.mrf.mxu1 }
0x11e4   :  { %2585 = vst [vmem:[#allocation14 + $0x10] sm:$0xff] %v2555_v53  ;;  %v2570_v58 = vadd.f32 %v2802_v40, %v2665_v20 }
0x11e5   :  { %v2564_v13 = vpop.f32.mrf.mxu1 }
0x11e6   :  { %2588 = vst [vmem:[#allocation14 + $0x28] sm:$0xff] %v2570_v58  ;;  %v2565_v47 = vadd.f32 %v2665_v20, %v2564_v13 }
0x11e7   :  { %v2805_v25 = vpop.f32.mrf.mxu1 }
0x11e8   :  { %2587 = vst [vmem:[#allocation14 + $0x20] sm:$0xff] %v2565_v47  ;;  %v2580_v34 = vadd.f32 %v2805_v25, %v2665_v20 }
0x11e9   :  { %v2574_v37 = vpop.f32.mrf.mxu1 }
0x11ea   :  { %2590 = vst [vmem:[#allocation14 + $0x38] sm:$0xff] %v2580_v34  ;;  %v2575_v31 = vadd.f32 %v2665_v20, %v2574_v37 }
0x11ec   :  { %2589 = vst [vmem:[#allocation14 + $0x30] sm:$0xff] %v2575_v31 }
0x11ed   :  { %3074 = shalt.err (!%p3071_p1)
}
0x11ee   :  { %2602 = dma.vmem_to_hbm [thread:$0]  %s2597_s6, 1024, %s4135_s7, [#allocation7], %s3092_s27, %s3092_s27, %s3093_s28  }
0x11ef   :  { %3089 = dma.done.wait [#allocation7], 1024  }
0x11f0   :  { %3090 = vsyncadd [#allocation7], 4294966272 }
0x11f1   :  { %2606 = vsyncpa [#allocation6], 1 }
0x11f2   :  { %2607 = vsyncpa [#allocation9], 1 }
0x11f3   :  { %2608 = vsyncpa [#allocation12], 1 }
0x11f4   :  { %2609 = vsyncpa [#allocation7], 1 }

</bundles_post_ra>
